<compile_context>
chip_gen: v5e
topology: v5e:2x2
jax: 0.10.0
libtpu: 0.0.40
codegen_flags: <defaults>
</compile_context>

<pallas_src>
import jax
import jax.numpy as jnp
from jax.experimental import pallas as pl
from jax.experimental.pallas import tpu as pltpu


def _myblock_kernel(x_ref, w1_ref, b1_ref, w2_ref, b2_ref, out_ref):
    # Per grid step: B batch samples.
    B, _, H, W = x_ref.shape
    C1, C2, K = 3, 3, 3
    H1, W1 = H - K + 1, W - K + 1      # conv1 output spatial
    H2, W2 = H1 - K + 1, W1 - K + 1    # conv2 output spatial
    Hp, Wp = H2 // 2, W2 // 2          # max_pool2d(2) output spatial (floor mode)

    x = x_ref[:, 0]                    # (B, H, W), already float32

    # ---- conv1 (1 -> 3, 3x3, valid) + ReLU ----------------------------------
    # Hoist the 9 shifted views of x out of the oc loop (built once, reused 3x).
    x_shift = [[x[:, ky:ky + H1, kx:kx + W1] for kx in range(K)] for ky in range(K)]
    y1 = []
    for oc in range(C1):
        acc = None
        for ky in range(K):
            for kx in range(K):
                term = w1_ref[oc * (K * K) + ky * K + kx] * x_shift[ky][kx]
                acc = term if acc is None else acc + term
        y1.append(jnp.maximum(acc + b1_ref[oc], 0.0))          # (B, H1, W1)

    # ---- conv2 (3 -> 3, 3x3, valid) + ReLU ----------------------------------
    # Hoist the 27 shifted views of y1 out of the oc loop (built once, reused 3x).
    y1_shift = [[[y1[ic][:, ky:ky + H2, kx:kx + W2] for kx in range(K)]
                 for ky in range(K)] for ic in range(C1)]
    y2 = []
    for oc in range(C2):
        acc = None
        for ic in range(C1):
            for ky in range(K):
                for kx in range(K):
                    w = w2_ref[oc * (C1 * K * K) + ic * (K * K) + ky * K + kx]
                    term = w * y1_shift[ic][ky][kx]
                    acc = term if acc is None else acc + term
        y2.append(jnp.maximum(acc + b2_ref[oc], 0.0))           # (B, H2, W2)

    # ---- max_pool2d(kernel=2, stride=2), floor mode --------------------------
    # Stack channels first so the pairwise maxima and the even-index compaction run
    # ONCE on the (B, C2, H2, W2) slab instead of per channel (3x fewer XLU shuffles).
    a = jnp.stack(y2, axis=1)                                    # (B, C2, H2, W2)
    mw = jnp.maximum(a[..., :, 0:W2 - 1], a[..., :, 1:W2])       # (B, C2, H2, W2-1)
    mh = jnp.maximum(mw[..., 0:H2 - 1, :], mw[..., 1:H2, :])     # (B, C2, H2-1, W2-1)
    # mh[..., 2i, 2j] == max over a[..., 2i:2i+2, 2j:2j+2]
    cols = [mh[..., :, 2 * j:2 * j + 1] for j in range(Wp)]
    mc = jnp.concatenate(cols, axis=-1)                          # (B, C2, H2-1, Wp)
    rows = [mc[..., 2 * i:2 * i + 1, :] for i in range(Hp)]
    pooled = jnp.concatenate(rows, axis=-2)                      # (B, C2, Hp, Wp)

    out_ref[...] = pooled.astype(out_ref.dtype)                  # single fused store


def myblock_forward(x, w1, b1, w2, b2, samples_per_step=None):
    N, _, H, W = x.shape
    K = 3
    H1, W1 = H - K + 1, W - K + 1
    H2, W2 = H1 - K + 1, W1 - K + 1
    Hp, Wp = H2 // 2, W2 // 2

    if samples_per_step is None:
        # Amortize per-grid-step overhead (~0.35us/step) while keeping >= 2 grid steps so
        # that on v7x both TensorCores get work (neutral on single-TC v5e/v6e).
        samples_per_step = max(1, N // 2)
    # Must evenly divide the batch; fall back to the largest divisor.
    while N % samples_per_step:
        samples_per_step -= 1
    B = samples_per_step
    grid = (N // B,)

    # Advisory cost hint for XLA's scheduler (tiny kernel).
    flops = N * (3 * H1 * W1 * 2 * 9 + 3 * H2 * W2 * 2 * 27 + 3 * H2 * W2 * 3)
    bytes_accessed = 4 * (x.size + N * 3 * Hp * Wp + w1.size + b1.size + w2.size + b2.size)
    cost = pl.CostEstimate(flops=flops, transcendentals=0, bytes_accessed=bytes_accessed)

    return pl.pallas_call(
        _myblock_kernel,
        out_shape=jax.ShapeDtypeStruct((N, 3, Hp, Wp), jnp.float32),
        grid=grid,
        in_specs=[
            # B samples per grid step (block last-2 dims == full array dims -> allowed)
            pl.BlockSpec((B, 1, H, W), lambda n: (n, 0, 0, 0)),
            pl.BlockSpec(memory_space=pltpu.MemorySpace.SMEM),   # w1 (flattened scalars)
            pl.BlockSpec(memory_space=pltpu.MemorySpace.SMEM),   # b1
            pl.BlockSpec(memory_space=pltpu.MemorySpace.SMEM),   # w2 (flattened scalars)
            pl.BlockSpec(memory_space=pltpu.MemorySpace.SMEM),   # b2
        ],
        out_specs=pl.BlockSpec((B, 3, Hp, Wp), lambda n: (n, 0, 0, 0)),
        compiler_params=pltpu.CompilerParams(
            dimension_semantics=("parallel",)),
        cost_estimate=cost,
    )(x, w1.reshape(-1), b1, w2.reshape(-1), b2)


def ref_forward(x, w1, b1, w2, b2):
    dn = ('NCHW', 'OIHW', 'NCHW')
    hp = jax.lax.Precision.HIGHEST
    y = jax.lax.conv_general_dilated(x, w1, (1, 1), 'VALID',
                                     dimension_numbers=dn, precision=hp)
    y = jnp.maximum(y + b1[None, :, None, None], 0.0)
    y = jax.lax.conv_general_dilated(y, w2, (1, 1), 'VALID',
                                     dimension_numbers=dn, precision=hp)
    y = jnp.maximum(y + b2[None, :, None, None], 0.0)
    y = jax.lax.reduce_window(y, -jnp.inf, jax.lax.max,
                              window_dimensions=(1, 1, 2, 2),
                              window_strides=(1, 1, 2, 2), padding='VALID')
    return y


if __name__ == "__main__":
    key = jax.random.PRNGKey(0)
    k1, k2, k3, k4, k5 = jax.random.split(key, 5)

    # Deterministic params matching nn.Conv2d(1,3,3) / nn.Conv2d(3,3,3) shapes
    # (kaiming-uniform-like scaling, purely synthetic).
    fan1 = 1 * 3 * 3
    bound1 = 1.0 / (fan1 ** 0.5)
    w1 = jax.random.uniform(k1, (3, 1, 3, 3), jnp.float32, -bound1, bound1)
    b1 = jax.random.uniform(k2, (3,), jnp.float32, -bound1, bound1)

    fan2 = 3 * 3 * 3
    bound2 = 1.0 / (fan2 ** 0.5)
    w2 = jax.random.uniform(k3, (3, 3, 3, 3), jnp.float32, -bound2, bound2)
    b2 = jax.random.uniform(k4, (3,), jnp.float32, -bound2, bound2)

    # Input: batch=2, 1 channel (conv1 expects in_channels=1), 16x16 spatial.
    x = jax.random.normal(k5, (2, 1, 16, 16), jnp.float32)

    out = myblock_forward(x, w1, b1, w2, b2)
    out = jax.block_until_ready(out)

    ref = jax.block_until_ready(ref_forward(x, w1, b1, w2, b2))
    assert out.shape == (2, 3, 6, 6), out.shape
    assert jnp.allclose(out, ref, atol=1e-4, rtol=1e-4), \
        f"max abs diff {jnp.max(jnp.abs(out - ref))}"

    print("KERNEL_OK")
</pallas_src>

<mosaic_0001>
module attributes {stable_mosaic.version = 11 : i64} {
  func.func @_myblock_kernel(%arg0: i32, %arg1: memref<1x1x16x16xf32, #tpu.memory_space<vmem>>, %arg2: memref<27xf32, #tpu.memory_space<smem>>, %arg3: memref<3xf32, #tpu.memory_space<smem>>, %arg4: memref<81xf32, #tpu.memory_space<smem>>, %arg5: memref<3xf32, #tpu.memory_space<smem>>, %arg6: memref<1x3x6x6xf32, #tpu.memory_space<vmem>>) attributes {dimension_semantics = [#tpu.dimension_semantics<parallel>], iteration_bounds = array<i64: 2>, scalar_prefetch = 0 : i64, scratch_operands = 0 : i64, tpu.core_type = #tpu.core_type<tc>, window_params = [{transform_indices = @transform_0, window_bounds = array<i64: 1, 1, 16, 16>}, {transform_indices = @transform_1, window_bounds = array<i64: 27>}, {transform_indices = @transform_2, window_bounds = array<i64: 3>}, {transform_indices = @transform_3, window_bounds = array<i64: 81>}, {transform_indices = @transform_4, window_bounds = array<i64: 3>}, {transform_indices = @transform_5, window_bounds = array<i64: 1, 3, 6, 6>}]} {
    %c0 = arith.constant 0 : index
    %c0_0 = arith.constant 0 : index
    %c0_1 = arith.constant 0 : index
    %c0_2 = arith.constant 0 : index
    %0 = vector.load %arg1[%c0, %c0_0, %c0_1, %c0_2] : memref<1x1x16x16xf32, #tpu.memory_space<vmem>>, vector<1x1x16x16xf32>
    %1 = vector.shape_cast %0 : vector<1x1x16x16xf32> to vector<1x16x16xf32>
    %2 = vector.extract_strided_slice %1 {offsets = [0, 0, 0], sizes = [1, 14, 14], strides = [1, 1, 1]} : vector<1x16x16xf32> to vector<1x14x14xf32>
    %3 = vector.extract_strided_slice %1 {offsets = [0, 0, 1], sizes = [1, 14, 14], strides = [1, 1, 1]} : vector<1x16x16xf32> to vector<1x14x14xf32>
    %4 = vector.extract_strided_slice %1 {offsets = [0, 0, 2], sizes = [1, 14, 14], strides = [1, 1, 1]} : vector<1x16x16xf32> to vector<1x14x14xf32>
    %5 = vector.extract_strided_slice %1 {offsets = [0, 1, 0], sizes = [1, 14, 14], strides = [1, 1, 1]} : vector<1x16x16xf32> to vector<1x14x14xf32>
    %6 = vector.extract_strided_slice %1 {offsets = [0, 1, 1], sizes = [1, 14, 14], strides = [1, 1, 1]} : vector<1x16x16xf32> to vector<1x14x14xf32>
    %7 = vector.extract_strided_slice %1 {offsets = [0, 1, 2], sizes = [1, 14, 14], strides = [1, 1, 1]} : vector<1x16x16xf32> to vector<1x14x14xf32>
    %8 = vector.extract_strided_slice %1 {offsets = [0, 2, 0], sizes = [1, 14, 14], strides = [1, 1, 1]} : vector<1x16x16xf32> to vector<1x14x14xf32>
    %9 = vector.extract_strided_slice %1 {offsets = [0, 2, 1], sizes = [1, 14, 14], strides = [1, 1, 1]} : vector<1x16x16xf32> to vector<1x14x14xf32>
    %10 = vector.extract_strided_slice %1 {offsets = [0, 2, 2], sizes = [1, 14, 14], strides = [1, 1, 1]} : vector<1x16x16xf32> to vector<1x14x14xf32>
    %c0_3 = arith.constant 0 : index
    %11 = memref.load %arg2[%c0_3] : memref<27xf32, #tpu.memory_space<smem>>
    %12 = vector.broadcast %11 : f32 to vector<1x14x14xf32>
    %13 = arith.mulf %12, %2 : vector<1x14x14xf32>
    %c1 = arith.constant 1 : index
    %14 = memref.load %arg2[%c1] : memref<27xf32, #tpu.memory_space<smem>>
    %15 = vector.broadcast %14 : f32 to vector<1x14x14xf32>
    %16 = arith.mulf %15, %3 : vector<1x14x14xf32>
    %17 = arith.addf %13, %16 : vector<1x14x14xf32>
    %c2 = arith.constant 2 : index
    %18 = memref.load %arg2[%c2] : memref<27xf32, #tpu.memory_space<smem>>
    %19 = vector.broadcast %18 : f32 to vector<1x14x14xf32>
    %20 = arith.mulf %19, %4 : vector<1x14x14xf32>
    %21 = arith.addf %17, %20 : vector<1x14x14xf32>
    %c3 = arith.constant 3 : index
    %22 = memref.load %arg2[%c3] : memref<27xf32, #tpu.memory_space<smem>>
    %23 = vector.broadcast %22 : f32 to vector<1x14x14xf32>
    %24 = arith.mulf %23, %5 : vector<1x14x14xf32>
    %25 = arith.addf %21, %24 : vector<1x14x14xf32>
    %c4 = arith.constant 4 : index
    %26 = memref.load %arg2[%c4] : memref<27xf32, #tpu.memory_space<smem>>
    %27 = vector.broadcast %26 : f32 to vector<1x14x14xf32>
    %28 = arith.mulf %27, %6 : vector<1x14x14xf32>
    %29 = arith.addf %25, %28 : vector<1x14x14xf32>
    %c5 = arith.constant 5 : index
    %30 = memref.load %arg2[%c5] : memref<27xf32, #tpu.memory_space<smem>>
    %31 = vector.broadcast %30 : f32 to vector<1x14x14xf32>
    %32 = arith.mulf %31, %7 : vector<1x14x14xf32>
    %33 = arith.addf %29, %32 : vector<1x14x14xf32>
    %c6 = arith.constant 6 : index
    %34 = memref.load %arg2[%c6] : memref<27xf32, #tpu.memory_space<smem>>
    %35 = vector.broadcast %34 : f32 to vector<1x14x14xf32>
    %36 = arith.mulf %35, %8 : vector<1x14x14xf32>
    %37 = arith.addf %33, %36 : vector<1x14x14xf32>
    %c7 = arith.constant 7 : index
    %38 = memref.load %arg2[%c7] : memref<27xf32, #tpu.memory_space<smem>>
    %39 = vector.broadcast %38 : f32 to vector<1x14x14xf32>
    %40 = arith.mulf %39, %9 : vector<1x14x14xf32>
    %41 = arith.addf %37, %40 : vector<1x14x14xf32>
    %c8 = arith.constant 8 : index
    %42 = memref.load %arg2[%c8] : memref<27xf32, #tpu.memory_space<smem>>
    %43 = vector.broadcast %42 : f32 to vector<1x14x14xf32>
    %44 = arith.mulf %43, %10 : vector<1x14x14xf32>
    %45 = arith.addf %41, %44 : vector<1x14x14xf32>
    %c0_4 = arith.constant 0 : index
    %46 = memref.load %arg3[%c0_4] : memref<3xf32, #tpu.memory_space<smem>>
    %47 = vector.broadcast %46 : f32 to vector<1x14x14xf32>
    %48 = arith.addf %45, %47 : vector<1x14x14xf32>
    %cst = arith.constant 0.000000e+00 : f32
    %49 = vector.broadcast %cst : f32 to vector<1x14x14xf32>
    %50 = arith.maximumf %48, %49 : vector<1x14x14xf32>
    %c9 = arith.constant 9 : index
    %51 = memref.load %arg2[%c9] : memref<27xf32, #tpu.memory_space<smem>>
    %52 = vector.broadcast %51 : f32 to vector<1x14x14xf32>
    %53 = arith.mulf %52, %2 : vector<1x14x14xf32>
    %c10 = arith.constant 10 : index
    %54 = memref.load %arg2[%c10] : memref<27xf32, #tpu.memory_space<smem>>
    %55 = vector.broadcast %54 : f32 to vector<1x14x14xf32>
    %56 = arith.mulf %55, %3 : vector<1x14x14xf32>
    %57 = arith.addf %53, %56 : vector<1x14x14xf32>
    %c11 = arith.constant 11 : index
    %58 = memref.load %arg2[%c11] : memref<27xf32, #tpu.memory_space<smem>>
    %59 = vector.broadcast %58 : f32 to vector<1x14x14xf32>
    %60 = arith.mulf %59, %4 : vector<1x14x14xf32>
    %61 = arith.addf %57, %60 : vector<1x14x14xf32>
    %c12 = arith.constant 12 : index
    %62 = memref.load %arg2[%c12] : memref<27xf32, #tpu.memory_space<smem>>
    %63 = vector.broadcast %62 : f32 to vector<1x14x14xf32>
    %64 = arith.mulf %63, %5 : vector<1x14x14xf32>
    %65 = arith.addf %61, %64 : vector<1x14x14xf32>
    %c13 = arith.constant 13 : index
    %66 = memref.load %arg2[%c13] : memref<27xf32, #tpu.memory_space<smem>>
    %67 = vector.broadcast %66 : f32 to vector<1x14x14xf32>
    %68 = arith.mulf %67, %6 : vector<1x14x14xf32>
    %69 = arith.addf %65, %68 : vector<1x14x14xf32>
    %c14 = arith.constant 14 : index
    %70 = memref.load %arg2[%c14] : memref<27xf32, #tpu.memory_space<smem>>
    %71 = vector.broadcast %70 : f32 to vector<1x14x14xf32>
    %72 = arith.mulf %71, %7 : vector<1x14x14xf32>
    %73 = arith.addf %69, %72 : vector<1x14x14xf32>
    %c15 = arith.constant 15 : index
    %74 = memref.load %arg2[%c15] : memref<27xf32, #tpu.memory_space<smem>>
    %75 = vector.broadcast %74 : f32 to vector<1x14x14xf32>
    %76 = arith.mulf %75, %8 : vector<1x14x14xf32>
    %77 = arith.addf %73, %76 : vector<1x14x14xf32>
    %c16 = arith.constant 16 : index
    %78 = memref.load %arg2[%c16] : memref<27xf32, #tpu.memory_space<smem>>
    %79 = vector.broadcast %78 : f32 to vector<1x14x14xf32>
    %80 = arith.mulf %79, %9 : vector<1x14x14xf32>
    %81 = arith.addf %77, %80 : vector<1x14x14xf32>
    %c17 = arith.constant 17 : index
    %82 = memref.load %arg2[%c17] : memref<27xf32, #tpu.memory_space<smem>>
    %83 = vector.broadcast %82 : f32 to vector<1x14x14xf32>
    %84 = arith.mulf %83, %10 : vector<1x14x14xf32>
    %85 = arith.addf %81, %84 : vector<1x14x14xf32>
    %c1_5 = arith.constant 1 : index
    %86 = memref.load %arg3[%c1_5] : memref<3xf32, #tpu.memory_space<smem>>
    %87 = vector.broadcast %86 : f32 to vector<1x14x14xf32>
    %88 = arith.addf %85, %87 : vector<1x14x14xf32>
    %cst_6 = arith.constant 0.000000e+00 : f32
    %89 = vector.broadcast %cst_6 : f32 to vector<1x14x14xf32>
    %90 = arith.maximumf %88, %89 : vector<1x14x14xf32>
    %c18 = arith.constant 18 : index
    %91 = memref.load %arg2[%c18] : memref<27xf32, #tpu.memory_space<smem>>
    %92 = vector.broadcast %91 : f32 to vector<1x14x14xf32>
    %93 = arith.mulf %92, %2 : vector<1x14x14xf32>
    %c19 = arith.constant 19 : index
    %94 = memref.load %arg2[%c19] : memref<27xf32, #tpu.memory_space<smem>>
    %95 = vector.broadcast %94 : f32 to vector<1x14x14xf32>
    %96 = arith.mulf %95, %3 : vector<1x14x14xf32>
    %97 = arith.addf %93, %96 : vector<1x14x14xf32>
    %c20 = arith.constant 20 : index
    %98 = memref.load %arg2[%c20] : memref<27xf32, #tpu.memory_space<smem>>
    %99 = vector.broadcast %98 : f32 to vector<1x14x14xf32>
    %100 = arith.mulf %99, %4 : vector<1x14x14xf32>
    %101 = arith.addf %97, %100 : vector<1x14x14xf32>
    %c21 = arith.constant 21 : index
    %102 = memref.load %arg2[%c21] : memref<27xf32, #tpu.memory_space<smem>>
    %103 = vector.broadcast %102 : f32 to vector<1x14x14xf32>
    %104 = arith.mulf %103, %5 : vector<1x14x14xf32>
    %105 = arith.addf %101, %104 : vector<1x14x14xf32>
    %c22 = arith.constant 22 : index
    %106 = memref.load %arg2[%c22] : memref<27xf32, #tpu.memory_space<smem>>
    %107 = vector.broadcast %106 : f32 to vector<1x14x14xf32>
    %108 = arith.mulf %107, %6 : vector<1x14x14xf32>
    %109 = arith.addf %105, %108 : vector<1x14x14xf32>
    %c23 = arith.constant 23 : index
    %110 = memref.load %arg2[%c23] : memref<27xf32, #tpu.memory_space<smem>>
    %111 = vector.broadcast %110 : f32 to vector<1x14x14xf32>
    %112 = arith.mulf %111, %7 : vector<1x14x14xf32>
    %113 = arith.addf %109, %112 : vector<1x14x14xf32>
    %c24 = arith.constant 24 : index
    %114 = memref.load %arg2[%c24] : memref<27xf32, #tpu.memory_space<smem>>
    %115 = vector.broadcast %114 : f32 to vector<1x14x14xf32>
    %116 = arith.mulf %115, %8 : vector<1x14x14xf32>
    %117 = arith.addf %113, %116 : vector<1x14x14xf32>
    %c25 = arith.constant 25 : index
    %118 = memref.load %arg2[%c25] : memref<27xf32, #tpu.memory_space<smem>>
    %119 = vector.broadcast %118 : f32 to vector<1x14x14xf32>
    %120 = arith.mulf %119, %9 : vector<1x14x14xf32>
    %121 = arith.addf %117, %120 : vector<1x14x14xf32>
    %c26 = arith.constant 26 : index
    %122 = memref.load %arg2[%c26] : memref<27xf32, #tpu.memory_space<smem>>
    %123 = vector.broadcast %122 : f32 to vector<1x14x14xf32>
    %124 = arith.mulf %123, %10 : vector<1x14x14xf32>
    %125 = arith.addf %121, %124 : vector<1x14x14xf32>
    %c2_7 = arith.constant 2 : index
    %126 = memref.load %arg3[%c2_7] : memref<3xf32, #tpu.memory_space<smem>>
    %127 = vector.broadcast %126 : f32 to vector<1x14x14xf32>
    %128 = arith.addf %125, %127 : vector<1x14x14xf32>
    %cst_8 = arith.constant 0.000000e+00 : f32
    %129 = vector.broadcast %cst_8 : f32 to vector<1x14x14xf32>
    %130 = arith.maximumf %128, %129 : vector<1x14x14xf32>
    %131 = vector.extract_strided_slice %50 {offsets = [0, 0, 0], sizes = [1, 12, 12], strides = [1, 1, 1]} : vector<1x14x14xf32> to vector<1x12x12xf32>
    %132 = vector.extract_strided_slice %50 {offsets = [0, 0, 1], sizes = [1, 12, 12], strides = [1, 1, 1]} : vector<1x14x14xf32> to vector<1x12x12xf32>
    %133 = vector.extract_strided_slice %50 {offsets = [0, 0, 2], sizes = [1, 12, 12], strides = [1, 1, 1]} : vector<1x14x14xf32> to vector<1x12x12xf32>
    %134 = vector.extract_strided_slice %50 {offsets = [0, 1, 0], sizes = [1, 12, 12], strides = [1, 1, 1]} : vector<1x14x14xf32> to vector<1x12x12xf32>
    %135 = vector.extract_strided_slice %50 {offsets = [0, 1, 1], sizes = [1, 12, 12], strides = [1, 1, 1]} : vector<1x14x14xf32> to vector<1x12x12xf32>
    %136 = vector.extract_strided_slice %50 {offsets = [0, 1, 2], sizes = [1, 12, 12], strides = [1, 1, 1]} : vector<1x14x14xf32> to vector<1x12x12xf32>
    %137 = vector.extract_strided_slice %50 {offsets = [0, 2, 0], sizes = [1, 12, 12], strides = [1, 1, 1]} : vector<1x14x14xf32> to vector<1x12x12xf32>
    %138 = vector.extract_strided_slice %50 {offsets = [0, 2, 1], sizes = [1, 12, 12], strides = [1, 1, 1]} : vector<1x14x14xf32> to vector<1x12x12xf32>
    %139 = vector.extract_strided_slice %50 {offsets = [0, 2, 2], sizes = [1, 12, 12], strides = [1, 1, 1]} : vector<1x14x14xf32> to vector<1x12x12xf32>
    %140 = vector.extract_strided_slice %90 {offsets = [0, 0, 0], sizes = [1, 12, 12], strides = [1, 1, 1]} : vector<1x14x14xf32> to vector<1x12x12xf32>
    %141 = vector.extract_strided_slice %90 {offsets = [0, 0, 1], sizes = [1, 12, 12], strides = [1, 1, 1]} : vector<1x14x14xf32> to vector<1x12x12xf32>
    %142 = vector.extract_strided_slice %90 {offsets = [0, 0, 2], sizes = [1, 12, 12], strides = [1, 1, 1]} : vector<1x14x14xf32> to vector<1x12x12xf32>
    %143 = vector.extract_strided_slice %90 {offsets = [0, 1, 0], sizes = [1, 12, 12], strides = [1, 1, 1]} : vector<1x14x14xf32> to vector<1x12x12xf32>
    %144 = vector.extract_strided_slice %90 {offsets = [0, 1, 1], sizes = [1, 12, 12], strides = [1, 1, 1]} : vector<1x14x14xf32> to vector<1x12x12xf32>
    %145 = vector.extract_strided_slice %90 {offsets = [0, 1, 2], sizes = [1, 12, 12], strides = [1, 1, 1]} : vector<1x14x14xf32> to vector<1x12x12xf32>
    %146 = vector.extract_strided_slice %90 {offsets = [0, 2, 0], sizes = [1, 12, 12], strides = [1, 1, 1]} : vector<1x14x14xf32> to vector<1x12x12xf32>
    %147 = vector.extract_strided_slice %90 {offsets = [0, 2, 1], sizes = [1, 12, 12], strides = [1, 1, 1]} : vector<1x14x14xf32> to vector<1x12x12xf32>
    %148 = vector.extract_strided_slice %90 {offsets = [0, 2, 2], sizes = [1, 12, 12], strides = [1, 1, 1]} : vector<1x14x14xf32> to vector<1x12x12xf32>
    %149 = vector.extract_strided_slice %130 {offsets = [0, 0, 0], sizes = [1, 12, 12], strides = [1, 1, 1]} : vector<1x14x14xf32> to vector<1x12x12xf32>
    %150 = vector.extract_strided_slice %130 {offsets = [0, 0, 1], sizes = [1, 12, 12], strides = [1, 1, 1]} : vector<1x14x14xf32> to vector<1x12x12xf32>
    %151 = vector.extract_strided_slice %130 {offsets = [0, 0, 2], sizes = [1, 12, 12], strides = [1, 1, 1]} : vector<1x14x14xf32> to vector<1x12x12xf32>
    %152 = vector.extract_strided_slice %130 {offsets = [0, 1, 0], sizes = [1, 12, 12], strides = [1, 1, 1]} : vector<1x14x14xf32> to vector<1x12x12xf32>
    %153 = vector.extract_strided_slice %130 {offsets = [0, 1, 1], sizes = [1, 12, 12], strides = [1, 1, 1]} : vector<1x14x14xf32> to vector<1x12x12xf32>
    %154 = vector.extract_strided_slice %130 {offsets = [0, 1, 2], sizes = [1, 12, 12], strides = [1, 1, 1]} : vector<1x14x14xf32> to vector<1x12x12xf32>
    %155 = vector.extract_strided_slice %130 {offsets = [0, 2, 0], sizes = [1, 12, 12], strides = [1, 1, 1]} : vector<1x14x14xf32> to vector<1x12x12xf32>
    %156 = vector.extract_strided_slice %130 {offsets = [0, 2, 1], sizes = [1, 12, 12], strides = [1, 1, 1]} : vector<1x14x14xf32> to vector<1x12x12xf32>
    %157 = vector.extract_strided_slice %130 {offsets = [0, 2, 2], sizes = [1, 12, 12], strides = [1, 1, 1]} : vector<1x14x14xf32> to vector<1x12x12xf32>
    %c0_9 = arith.constant 0 : index
    %158 = memref.load %arg4[%c0_9] : memref<81xf32, #tpu.memory_space<smem>>
    %159 = vector.broadcast %158 : f32 to vector<1x12x12xf32>
    %160 = arith.mulf %159, %131 : vector<1x12x12xf32>
    %c1_10 = arith.constant 1 : index
    %161 = memref.load %arg4[%c1_10] : memref<81xf32, #tpu.memory_space<smem>>
    %162 = vector.broadcast %161 : f32 to vector<1x12x12xf32>
    %163 = arith.mulf %162, %132 : vector<1x12x12xf32>
    %164 = arith.addf %160, %163 : vector<1x12x12xf32>
    %c2_11 = arith.constant 2 : index
    %165 = memref.load %arg4[%c2_11] : memref<81xf32, #tpu.memory_space<smem>>
    %166 = vector.broadcast %165 : f32 to vector<1x12x12xf32>
    %167 = arith.mulf %166, %133 : vector<1x12x12xf32>
    %168 = arith.addf %164, %167 : vector<1x12x12xf32>
    %c3_12 = arith.constant 3 : index
    %169 = memref.load %arg4[%c3_12] : memref<81xf32, #tpu.memory_space<smem>>
    %170 = vector.broadcast %169 : f32 to vector<1x12x12xf32>
    %171 = arith.mulf %170, %134 : vector<1x12x12xf32>
    %172 = arith.addf %168, %171 : vector<1x12x12xf32>
    %c4_13 = arith.constant 4 : index
    %173 = memref.load %arg4[%c4_13] : memref<81xf32, #tpu.memory_space<smem>>
    %174 = vector.broadcast %173 : f32 to vector<1x12x12xf32>
    %175 = arith.mulf %174, %135 : vector<1x12x12xf32>
    %176 = arith.addf %172, %175 : vector<1x12x12xf32>
    %c5_14 = arith.constant 5 : index
    %177 = memref.load %arg4[%c5_14] : memref<81xf32, #tpu.memory_space<smem>>
    %178 = vector.broadcast %177 : f32 to vector<1x12x12xf32>
    %179 = arith.mulf %178, %136 : vector<1x12x12xf32>
    %180 = arith.addf %176, %179 : vector<1x12x12xf32>
    %c6_15 = arith.constant 6 : index
    %181 = memref.load %arg4[%c6_15] : memref<81xf32, #tpu.memory_space<smem>>
    %182 = vector.broadcast %181 : f32 to vector<1x12x12xf32>
    %183 = arith.mulf %182, %137 : vector<1x12x12xf32>
    %184 = arith.addf %180, %183 : vector<1x12x12xf32>
    %c7_16 = arith.constant 7 : index
    %185 = memref.load %arg4[%c7_16] : memref<81xf32, #tpu.memory_space<smem>>
    %186 = vector.broadcast %185 : f32 to vector<1x12x12xf32>
    %187 = arith.mulf %186, %138 : vector<1x12x12xf32>
    %188 = arith.addf %184, %187 : vector<1x12x12xf32>
    %c8_17 = arith.constant 8 : index
    %189 = memref.load %arg4[%c8_17] : memref<81xf32, #tpu.memory_space<smem>>
    %190 = vector.broadcast %189 : f32 to vector<1x12x12xf32>
    %191 = arith.mulf %190, %139 : vector<1x12x12xf32>
    %192 = arith.addf %188, %191 : vector<1x12x12xf32>
    %c9_18 = arith.constant 9 : index
    %193 = memref.load %arg4[%c9_18] : memref<81xf32, #tpu.memory_space<smem>>
    %194 = vector.broadcast %193 : f32 to vector<1x12x12xf32>
    %195 = arith.mulf %194, %140 : vector<1x12x12xf32>
    %196 = arith.addf %192, %195 : vector<1x12x12xf32>
    %c10_19 = arith.constant 10 : index
    %197 = memref.load %arg4[%c10_19] : memref<81xf32, #tpu.memory_space<smem>>
    %198 = vector.broadcast %197 : f32 to vector<1x12x12xf32>
    %199 = arith.mulf %198, %141 : vector<1x12x12xf32>
    %200 = arith.addf %196, %199 : vector<1x12x12xf32>
    %c11_20 = arith.constant 11 : index
    %201 = memref.load %arg4[%c11_20] : memref<81xf32, #tpu.memory_space<smem>>
    %202 = vector.broadcast %201 : f32 to vector<1x12x12xf32>
    %203 = arith.mulf %202, %142 : vector<1x12x12xf32>
    %204 = arith.addf %200, %203 : vector<1x12x12xf32>
    %c12_21 = arith.constant 12 : index
    %205 = memref.load %arg4[%c12_21] : memref<81xf32, #tpu.memory_space<smem>>
    %206 = vector.broadcast %205 : f32 to vector<1x12x12xf32>
    %207 = arith.mulf %206, %143 : vector<1x12x12xf32>
    %208 = arith.addf %204, %207 : vector<1x12x12xf32>
    %c13_22 = arith.constant 13 : index
    %209 = memref.load %arg4[%c13_22] : memref<81xf32, #tpu.memory_space<smem>>
    %210 = vector.broadcast %209 : f32 to vector<1x12x12xf32>
    %211 = arith.mulf %210, %144 : vector<1x12x12xf32>
    %212 = arith.addf %208, %211 : vector<1x12x12xf32>
    %c14_23 = arith.constant 14 : index
    %213 = memref.load %arg4[%c14_23] : memref<81xf32, #tpu.memory_space<smem>>
    %214 = vector.broadcast %213 : f32 to vector<1x12x12xf32>
    %215 = arith.mulf %214, %145 : vector<1x12x12xf32>
    %216 = arith.addf %212, %215 : vector<1x12x12xf32>
    %c15_24 = arith.constant 15 : index
    %217 = memref.load %arg4[%c15_24] : memref<81xf32, #tpu.memory_space<smem>>
    %218 = vector.broadcast %217 : f32 to vector<1x12x12xf32>
    %219 = arith.mulf %218, %146 : vector<1x12x12xf32>
    %220 = arith.addf %216, %219 : vector<1x12x12xf32>
    %c16_25 = arith.constant 16 : index
    %221 = memref.load %arg4[%c16_25] : memref<81xf32, #tpu.memory_space<smem>>
    %222 = vector.broadcast %221 : f32 to vector<1x12x12xf32>
    %223 = arith.mulf %222, %147 : vector<1x12x12xf32>
    %224 = arith.addf %220, %223 : vector<1x12x12xf32>
    %c17_26 = arith.constant 17 : index
    %225 = memref.load %arg4[%c17_26] : memref<81xf32, #tpu.memory_space<smem>>
    %226 = vector.broadcast %225 : f32 to vector<1x12x12xf32>
    %227 = arith.mulf %226, %148 : vector<1x12x12xf32>
    %228 = arith.addf %224, %227 : vector<1x12x12xf32>
    %c18_27 = arith.constant 18 : index
    %229 = memref.load %arg4[%c18_27] : memref<81xf32, #tpu.memory_space<smem>>
    %230 = vector.broadcast %229 : f32 to vector<1x12x12xf32>
    %231 = arith.mulf %230, %149 : vector<1x12x12xf32>
    %232 = arith.addf %228, %231 : vector<1x12x12xf32>
    %c19_28 = arith.constant 19 : index
    %233 = memref.load %arg4[%c19_28] : memref<81xf32, #tpu.memory_space<smem>>
    %234 = vector.broadcast %233 : f32 to vector<1x12x12xf32>
    %235 = arith.mulf %234, %150 : vector<1x12x12xf32>
    %236 = arith.addf %232, %235 : vector<1x12x12xf32>
    %c20_29 = arith.constant 20 : index
    %237 = memref.load %arg4[%c20_29] : memref<81xf32, #tpu.memory_space<smem>>
    %238 = vector.broadcast %237 : f32 to vector<1x12x12xf32>
    %239 = arith.mulf %238, %151 : vector<1x12x12xf32>
    %240 = arith.addf %236, %239 : vector<1x12x12xf32>
    %c21_30 = arith.constant 21 : index
    %241 = memref.load %arg4[%c21_30] : memref<81xf32, #tpu.memory_space<smem>>
    %242 = vector.broadcast %241 : f32 to vector<1x12x12xf32>
    %243 = arith.mulf %242, %152 : vector<1x12x12xf32>
    %244 = arith.addf %240, %243 : vector<1x12x12xf32>
    %c22_31 = arith.constant 22 : index
    %245 = memref.load %arg4[%c22_31] : memref<81xf32, #tpu.memory_space<smem>>
    %246 = vector.broadcast %245 : f32 to vector<1x12x12xf32>
    %247 = arith.mulf %246, %153 : vector<1x12x12xf32>
    %248 = arith.addf %244, %247 : vector<1x12x12xf32>
    %c23_32 = arith.constant 23 : index
    %249 = memref.load %arg4[%c23_32] : memref<81xf32, #tpu.memory_space<smem>>
    %250 = vector.broadcast %249 : f32 to vector<1x12x12xf32>
    %251 = arith.mulf %250, %154 : vector<1x12x12xf32>
    %252 = arith.addf %248, %251 : vector<1x12x12xf32>
    %c24_33 = arith.constant 24 : index
    %253 = memref.load %arg4[%c24_33] : memref<81xf32, #tpu.memory_space<smem>>
    %254 = vector.broadcast %253 : f32 to vector<1x12x12xf32>
    %255 = arith.mulf %254, %155 : vector<1x12x12xf32>
    %256 = arith.addf %252, %255 : vector<1x12x12xf32>
    %c25_34 = arith.constant 25 : index
    %257 = memref.load %arg4[%c25_34] : memref<81xf32, #tpu.memory_space<smem>>
    %258 = vector.broadcast %257 : f32 to vector<1x12x12xf32>
    %259 = arith.mulf %258, %156 : vector<1x12x12xf32>
    %260 = arith.addf %256, %259 : vector<1x12x12xf32>
    %c26_35 = arith.constant 26 : index
    %261 = memref.load %arg4[%c26_35] : memref<81xf32, #tpu.memory_space<smem>>
    %262 = vector.broadcast %261 : f32 to vector<1x12x12xf32>
    %263 = arith.mulf %262, %157 : vector<1x12x12xf32>
    %264 = arith.addf %260, %263 : vector<1x12x12xf32>
    %c0_36 = arith.constant 0 : index
    %265 = memref.load %arg5[%c0_36] : memref<3xf32, #tpu.memory_space<smem>>
    %266 = vector.broadcast %265 : f32 to vector<1x12x12xf32>
    %267 = arith.addf %264, %266 : vector<1x12x12xf32>
    %cst_37 = arith.constant 0.000000e+00 : f32
    %268 = vector.broadcast %cst_37 : f32 to vector<1x12x12xf32>
    %269 = arith.maximumf %267, %268 : vector<1x12x12xf32>
    %c27 = arith.constant 27 : index
    %270 = memref.load %arg4[%c27] : memref<81xf32, #tpu.memory_space<smem>>
    %271 = vector.broadcast %270 : f32 to vector<1x12x12xf32>
    %272 = arith.mulf %271, %131 : vector<1x12x12xf32>
    %c28 = arith.constant 28 : index
    %273 = memref.load %arg4[%c28] : memref<81xf32, #tpu.memory_space<smem>>
    %274 = vector.broadcast %273 : f32 to vector<1x12x12xf32>
    %275 = arith.mulf %274, %132 : vector<1x12x12xf32>
    %276 = arith.addf %272, %275 : vector<1x12x12xf32>
    %c29 = arith.constant 29 : index
    %277 = memref.load %arg4[%c29] : memref<81xf32, #tpu.memory_space<smem>>
    %278 = vector.broadcast %277 : f32 to vector<1x12x12xf32>
    %279 = arith.mulf %278, %133 : vector<1x12x12xf32>
    %280 = arith.addf %276, %279 : vector<1x12x12xf32>
    %c30 = arith.constant 30 : index
    %281 = memref.load %arg4[%c30] : memref<81xf32, #tpu.memory_space<smem>>
    %282 = vector.broadcast %281 : f32 to vector<1x12x12xf32>
    %283 = arith.mulf %282, %134 : vector<1x12x12xf32>
    %284 = arith.addf %280, %283 : vector<1x12x12xf32>
    %c31 = arith.constant 31 : index
    %285 = memref.load %arg4[%c31] : memref<81xf32, #tpu.memory_space<smem>>
    %286 = vector.broadcast %285 : f32 to vector<1x12x12xf32>
    %287 = arith.mulf %286, %135 : vector<1x12x12xf32>
    %288 = arith.addf %284, %287 : vector<1x12x12xf32>
    %c32 = arith.constant 32 : index
    %289 = memref.load %arg4[%c32] : memref<81xf32, #tpu.memory_space<smem>>
    %290 = vector.broadcast %289 : f32 to vector<1x12x12xf32>
    %291 = arith.mulf %290, %136 : vector<1x12x12xf32>
    %292 = arith.addf %288, %291 : vector<1x12x12xf32>
    %c33 = arith.constant 33 : index
    %293 = memref.load %arg4[%c33] : memref<81xf32, #tpu.memory_space<smem>>
    %294 = vector.broadcast %293 : f32 to vector<1x12x12xf32>
    %295 = arith.mulf %294, %137 : vector<1x12x12xf32>
    %296 = arith.addf %292, %295 : vector<1x12x12xf32>
    %c34 = arith.constant 34 : index
    %297 = memref.load %arg4[%c34] : memref<81xf32, #tpu.memory_space<smem>>
    %298 = vector.broadcast %297 : f32 to vector<1x12x12xf32>
    %299 = arith.mulf %298, %138 : vector<1x12x12xf32>
    %300 = arith.addf %296, %299 : vector<1x12x12xf32>
    %c35 = arith.constant 35 : index
    %301 = memref.load %arg4[%c35] : memref<81xf32, #tpu.memory_space<smem>>
    %302 = vector.broadcast %301 : f32 to vector<1x12x12xf32>
    %303 = arith.mulf %302, %139 : vector<1x12x12xf32>
    %304 = arith.addf %300, %303 : vector<1x12x12xf32>
    %c36 = arith.constant 36 : index
    %305 = memref.load %arg4[%c36] : memref<81xf32, #tpu.memory_space<smem>>
    %306 = vector.broadcast %305 : f32 to vector<1x12x12xf32>
    %307 = arith.mulf %306, %140 : vector<1x12x12xf32>
    %308 = arith.addf %304, %307 : vector<1x12x12xf32>
    %c37 = arith.constant 37 : index
    %309 = memref.load %arg4[%c37] : memref<81xf32, #tpu.memory_space<smem>>
    %310 = vector.broadcast %309 : f32 to vector<1x12x12xf32>
    %311 = arith.mulf %310, %141 : vector<1x12x12xf32>
    %312 = arith.addf %308, %311 : vector<1x12x12xf32>
    %c38 = arith.constant 38 : index
    %313 = memref.load %arg4[%c38] : memref<81xf32, #tpu.memory_space<smem>>
    %314 = vector.broadcast %313 : f32 to vector<1x12x12xf32>
    %315 = arith.mulf %314, %142 : vector<1x12x12xf32>
    %316 = arith.addf %312, %315 : vector<1x12x12xf32>
    %c39 = arith.constant 39 : index
    %317 = memref.load %arg4[%c39] : memref<81xf32, #tpu.memory_space<smem>>
    %318 = vector.broadcast %317 : f32 to vector<1x12x12xf32>
    %319 = arith.mulf %318, %143 : vector<1x12x12xf32>
    %320 = arith.addf %316, %319 : vector<1x12x12xf32>
    %c40 = arith.constant 40 : index
    %321 = memref.load %arg4[%c40] : memref<81xf32, #tpu.memory_space<smem>>
    %322 = vector.broadcast %321 : f32 to vector<1x12x12xf32>
    %323 = arith.mulf %322, %144 : vector<1x12x12xf32>
    %324 = arith.addf %320, %323 : vector<1x12x12xf32>
    %c41 = arith.constant 41 : index
    %325 = memref.load %arg4[%c41] : memref<81xf32, #tpu.memory_space<smem>>
    %326 = vector.broadcast %325 : f32 to vector<1x12x12xf32>
    %327 = arith.mulf %326, %145 : vector<1x12x12xf32>
    %328 = arith.addf %324, %327 : vector<1x12x12xf32>
    %c42 = arith.constant 42 : index
    %329 = memref.load %arg4[%c42] : memref<81xf32, #tpu.memory_space<smem>>
    %330 = vector.broadcast %329 : f32 to vector<1x12x12xf32>
    %331 = arith.mulf %330, %146 : vector<1x12x12xf32>
    %332 = arith.addf %328, %331 : vector<1x12x12xf32>
    %c43 = arith.constant 43 : index
    %333 = memref.load %arg4[%c43] : memref<81xf32, #tpu.memory_space<smem>>
    %334 = vector.broadcast %333 : f32 to vector<1x12x12xf32>
    %335 = arith.mulf %334, %147 : vector<1x12x12xf32>
    %336 = arith.addf %332, %335 : vector<1x12x12xf32>
    %c44 = arith.constant 44 : index
    %337 = memref.load %arg4[%c44] : memref<81xf32, #tpu.memory_space<smem>>
    %338 = vector.broadcast %337 : f32 to vector<1x12x12xf32>
    %339 = arith.mulf %338, %148 : vector<1x12x12xf32>
    %340 = arith.addf %336, %339 : vector<1x12x12xf32>
    %c45 = arith.constant 45 : index
    %341 = memref.load %arg4[%c45] : memref<81xf32, #tpu.memory_space<smem>>
    %342 = vector.broadcast %341 : f32 to vector<1x12x12xf32>
    %343 = arith.mulf %342, %149 : vector<1x12x12xf32>
    %344 = arith.addf %340, %343 : vector<1x12x12xf32>
    %c46 = arith.constant 46 : index
    %345 = memref.load %arg4[%c46] : memref<81xf32, #tpu.memory_space<smem>>
    %346 = vector.broadcast %345 : f32 to vector<1x12x12xf32>
    %347 = arith.mulf %346, %150 : vector<1x12x12xf32>
    %348 = arith.addf %344, %347 : vector<1x12x12xf32>
    %c47 = arith.constant 47 : index
    %349 = memref.load %arg4[%c47] : memref<81xf32, #tpu.memory_space<smem>>
    %350 = vector.broadcast %349 : f32 to vector<1x12x12xf32>
    %351 = arith.mulf %350, %151 : vector<1x12x12xf32>
    %352 = arith.addf %348, %351 : vector<1x12x12xf32>
    %c48 = arith.constant 48 : index
    %353 = memref.load %arg4[%c48] : memref<81xf32, #tpu.memory_space<smem>>
    %354 = vector.broadcast %353 : f32 to vector<1x12x12xf32>
    %355 = arith.mulf %354, %152 : vector<1x12x12xf32>
    %356 = arith.addf %352, %355 : vector<1x12x12xf32>
    %c49 = arith.constant 49 : index
    %357 = memref.load %arg4[%c49] : memref<81xf32, #tpu.memory_space<smem>>
    %358 = vector.broadcast %357 : f32 to vector<1x12x12xf32>
    %359 = arith.mulf %358, %153 : vector<1x12x12xf32>
    %360 = arith.addf %356, %359 : vector<1x12x12xf32>
    %c50 = arith.constant 50 : index
    %361 = memref.load %arg4[%c50] : memref<81xf32, #tpu.memory_space<smem>>
    %362 = vector.broadcast %361 : f32 to vector<1x12x12xf32>
    %363 = arith.mulf %362, %154 : vector<1x12x12xf32>
    %364 = arith.addf %360, %363 : vector<1x12x12xf32>
    %c51 = arith.constant 51 : index
    %365 = memref.load %arg4[%c51] : memref<81xf32, #tpu.memory_space<smem>>
    %366 = vector.broadcast %365 : f32 to vector<1x12x12xf32>
    %367 = arith.mulf %366, %155 : vector<1x12x12xf32>
    %368 = arith.addf %364, %367 : vector<1x12x12xf32>
    %c52 = arith.constant 52 : index
    %369 = memref.load %arg4[%c52] : memref<81xf32, #tpu.memory_space<smem>>
    %370 = vector.broadcast %369 : f32 to vector<1x12x12xf32>
    %371 = arith.mulf %370, %156 : vector<1x12x12xf32>
    %372 = arith.addf %368, %371 : vector<1x12x12xf32>
    %c53 = arith.constant 53 : index
    %373 = memref.load %arg4[%c53] : memref<81xf32, #tpu.memory_space<smem>>
    %374 = vector.broadcast %373 : f32 to vector<1x12x12xf32>
    %375 = arith.mulf %374, %157 : vector<1x12x12xf32>
    %376 = arith.addf %372, %375 : vector<1x12x12xf32>
    %c1_38 = arith.constant 1 : index
    %377 = memref.load %arg5[%c1_38] : memref<3xf32, #tpu.memory_space<smem>>
    %378 = vector.broadcast %377 : f32 to vector<1x12x12xf32>
    %379 = arith.addf %376, %378 : vector<1x12x12xf32>
    %cst_39 = arith.constant 0.000000e+00 : f32
    %380 = vector.broadcast %cst_39 : f32 to vector<1x12x12xf32>
    %381 = arith.maximumf %379, %380 : vector<1x12x12xf32>
    %c54 = arith.constant 54 : index
    %382 = memref.load %arg4[%c54] : memref<81xf32, #tpu.memory_space<smem>>
    %383 = vector.broadcast %382 : f32 to vector<1x12x12xf32>
    %384 = arith.mulf %383, %131 : vector<1x12x12xf32>
    %c55 = arith.constant 55 : index
    %385 = memref.load %arg4[%c55] : memref<81xf32, #tpu.memory_space<smem>>
    %386 = vector.broadcast %385 : f32 to vector<1x12x12xf32>
    %387 = arith.mulf %386, %132 : vector<1x12x12xf32>
    %388 = arith.addf %384, %387 : vector<1x12x12xf32>
    %c56 = arith.constant 56 : index
    %389 = memref.load %arg4[%c56] : memref<81xf32, #tpu.memory_space<smem>>
    %390 = vector.broadcast %389 : f32 to vector<1x12x12xf32>
    %391 = arith.mulf %390, %133 : vector<1x12x12xf32>
    %392 = arith.addf %388, %391 : vector<1x12x12xf32>
    %c57 = arith.constant 57 : index
    %393 = memref.load %arg4[%c57] : memref<81xf32, #tpu.memory_space<smem>>
    %394 = vector.broadcast %393 : f32 to vector<1x12x12xf32>
    %395 = arith.mulf %394, %134 : vector<1x12x12xf32>
    %396 = arith.addf %392, %395 : vector<1x12x12xf32>
    %c58 = arith.constant 58 : index
    %397 = memref.load %arg4[%c58] : memref<81xf32, #tpu.memory_space<smem>>
    %398 = vector.broadcast %397 : f32 to vector<1x12x12xf32>
    %399 = arith.mulf %398, %135 : vector<1x12x12xf32>
    %400 = arith.addf %396, %399 : vector<1x12x12xf32>
    %c59 = arith.constant 59 : index
    %401 = memref.load %arg4[%c59] : memref<81xf32, #tpu.memory_space<smem>>
    %402 = vector.broadcast %401 : f32 to vector<1x12x12xf32>
    %403 = arith.mulf %402, %136 : vector<1x12x12xf32>
    %404 = arith.addf %400, %403 : vector<1x12x12xf32>
    %c60 = arith.constant 60 : index
    %405 = memref.load %arg4[%c60] : memref<81xf32, #tpu.memory_space<smem>>
    %406 = vector.broadcast %405 : f32 to vector<1x12x12xf32>
    %407 = arith.mulf %406, %137 : vector<1x12x12xf32>
    %408 = arith.addf %404, %407 : vector<1x12x12xf32>
    %c61 = arith.constant 61 : index
    %409 = memref.load %arg4[%c61] : memref<81xf32, #tpu.memory_space<smem>>
    %410 = vector.broadcast %409 : f32 to vector<1x12x12xf32>
    %411 = arith.mulf %410, %138 : vector<1x12x12xf32>
    %412 = arith.addf %408, %411 : vector<1x12x12xf32>
    %c62 = arith.constant 62 : index
    %413 = memref.load %arg4[%c62] : memref<81xf32, #tpu.memory_space<smem>>
    %414 = vector.broadcast %413 : f32 to vector<1x12x12xf32>
    %415 = arith.mulf %414, %139 : vector<1x12x12xf32>
    %416 = arith.addf %412, %415 : vector<1x12x12xf32>
    %c63 = arith.constant 63 : index
    %417 = memref.load %arg4[%c63] : memref<81xf32, #tpu.memory_space<smem>>
    %418 = vector.broadcast %417 : f32 to vector<1x12x12xf32>
    %419 = arith.mulf %418, %140 : vector<1x12x12xf32>
    %420 = arith.addf %416, %419 : vector<1x12x12xf32>
    %c64 = arith.constant 64 : index
    %421 = memref.load %arg4[%c64] : memref<81xf32, #tpu.memory_space<smem>>
    %422 = vector.broadcast %421 : f32 to vector<1x12x12xf32>
    %423 = arith.mulf %422, %141 : vector<1x12x12xf32>
    %424 = arith.addf %420, %423 : vector<1x12x12xf32>
    %c65 = arith.constant 65 : index
    %425 = memref.load %arg4[%c65] : memref<81xf32, #tpu.memory_space<smem>>
    %426 = vector.broadcast %425 : f32 to vector<1x12x12xf32>
    %427 = arith.mulf %426, %142 : vector<1x12x12xf32>
    %428 = arith.addf %424, %427 : vector<1x12x12xf32>
    %c66 = arith.constant 66 : index
    %429 = memref.load %arg4[%c66] : memref<81xf32, #tpu.memory_space<smem>>
    %430 = vector.broadcast %429 : f32 to vector<1x12x12xf32>
    %431 = arith.mulf %430, %143 : vector<1x12x12xf32>
    %432 = arith.addf %428, %431 : vector<1x12x12xf32>
    %c67 = arith.constant 67 : index
    %433 = memref.load %arg4[%c67] : memref<81xf32, #tpu.memory_space<smem>>
    %434 = vector.broadcast %433 : f32 to vector<1x12x12xf32>
    %435 = arith.mulf %434, %144 : vector<1x12x12xf32>
    %436 = arith.addf %432, %435 : vector<1x12x12xf32>
    %c68 = arith.constant 68 : index
    %437 = memref.load %arg4[%c68] : memref<81xf32, #tpu.memory_space<smem>>
    %438 = vector.broadcast %437 : f32 to vector<1x12x12xf32>
    %439 = arith.mulf %438, %145 : vector<1x12x12xf32>
    %440 = arith.addf %436, %439 : vector<1x12x12xf32>
    %c69 = arith.constant 69 : index
    %441 = memref.load %arg4[%c69] : memref<81xf32, #tpu.memory_space<smem>>
    %442 = vector.broadcast %441 : f32 to vector<1x12x12xf32>
    %443 = arith.mulf %442, %146 : vector<1x12x12xf32>
    %444 = arith.addf %440, %443 : vector<1x12x12xf32>
    %c70 = arith.constant 70 : index
    %445 = memref.load %arg4[%c70] : memref<81xf32, #tpu.memory_space<smem>>
    %446 = vector.broadcast %445 : f32 to vector<1x12x12xf32>
    %447 = arith.mulf %446, %147 : vector<1x12x12xf32>
    %448 = arith.addf %444, %447 : vector<1x12x12xf32>
    %c71 = arith.constant 71 : index
    %449 = memref.load %arg4[%c71] : memref<81xf32, #tpu.memory_space<smem>>
    %450 = vector.broadcast %449 : f32 to vector<1x12x12xf32>
    %451 = arith.mulf %450, %148 : vector<1x12x12xf32>
    %452 = arith.addf %448, %451 : vector<1x12x12xf32>
    %c72 = arith.constant 72 : index
    %453 = memref.load %arg4[%c72] : memref<81xf32, #tpu.memory_space<smem>>
    %454 = vector.broadcast %453 : f32 to vector<1x12x12xf32>
    %455 = arith.mulf %454, %149 : vector<1x12x12xf32>
    %456 = arith.addf %452, %455 : vector<1x12x12xf32>
    %c73 = arith.constant 73 : index
    %457 = memref.load %arg4[%c73] : memref<81xf32, #tpu.memory_space<smem>>
    %458 = vector.broadcast %457 : f32 to vector<1x12x12xf32>
    %459 = arith.mulf %458, %150 : vector<1x12x12xf32>
    %460 = arith.addf %456, %459 : vector<1x12x12xf32>
    %c74 = arith.constant 74 : index
    %461 = memref.load %arg4[%c74] : memref<81xf32, #tpu.memory_space<smem>>
    %462 = vector.broadcast %461 : f32 to vector<1x12x12xf32>
    %463 = arith.mulf %462, %151 : vector<1x12x12xf32>
    %464 = arith.addf %460, %463 : vector<1x12x12xf32>
    %c75 = arith.constant 75 : index
    %465 = memref.load %arg4[%c75] : memref<81xf32, #tpu.memory_space<smem>>
    %466 = vector.broadcast %465 : f32 to vector<1x12x12xf32>
    %467 = arith.mulf %466, %152 : vector<1x12x12xf32>
    %468 = arith.addf %464, %467 : vector<1x12x12xf32>
    %c76 = arith.constant 76 : index
    %469 = memref.load %arg4[%c76] : memref<81xf32, #tpu.memory_space<smem>>
    %470 = vector.broadcast %469 : f32 to vector<1x12x12xf32>
    %471 = arith.mulf %470, %153 : vector<1x12x12xf32>
    %472 = arith.addf %468, %471 : vector<1x12x12xf32>
    %c77 = arith.constant 77 : index
    %473 = memref.load %arg4[%c77] : memref<81xf32, #tpu.memory_space<smem>>
    %474 = vector.broadcast %473 : f32 to vector<1x12x12xf32>
    %475 = arith.mulf %474, %154 : vector<1x12x12xf32>
    %476 = arith.addf %472, %475 : vector<1x12x12xf32>
    %c78 = arith.constant 78 : index
    %477 = memref.load %arg4[%c78] : memref<81xf32, #tpu.memory_space<smem>>
    %478 = vector.broadcast %477 : f32 to vector<1x12x12xf32>
    %479 = arith.mulf %478, %155 : vector<1x12x12xf32>
    %480 = arith.addf %476, %479 : vector<1x12x12xf32>
    %c79 = arith.constant 79 : index
    %481 = memref.load %arg4[%c79] : memref<81xf32, #tpu.memory_space<smem>>
    %482 = vector.broadcast %481 : f32 to vector<1x12x12xf32>
    %483 = arith.mulf %482, %156 : vector<1x12x12xf32>
    %484 = arith.addf %480, %483 : vector<1x12x12xf32>
    %c80 = arith.constant 80 : index
    %485 = memref.load %arg4[%c80] : memref<81xf32, #tpu.memory_space<smem>>
    %486 = vector.broadcast %485 : f32 to vector<1x12x12xf32>
    %487 = arith.mulf %486, %157 : vector<1x12x12xf32>
    %488 = arith.addf %484, %487 : vector<1x12x12xf32>
    %c2_40 = arith.constant 2 : index
    %489 = memref.load %arg5[%c2_40] : memref<3xf32, #tpu.memory_space<smem>>
    %490 = vector.broadcast %489 : f32 to vector<1x12x12xf32>
    %491 = arith.addf %488, %490 : vector<1x12x12xf32>
    %cst_41 = arith.constant 0.000000e+00 : f32
    %492 = vector.broadcast %cst_41 : f32 to vector<1x12x12xf32>
    %493 = arith.maximumf %491, %492 : vector<1x12x12xf32>
    %494 = vector.shape_cast %269 : vector<1x12x12xf32> to vector<1x1x12x12xf32>
    %495 = vector.shape_cast %381 : vector<1x12x12xf32> to vector<1x1x12x12xf32>
    %496 = vector.shape_cast %493 : vector<1x12x12xf32> to vector<1x1x12x12xf32>
    %497 = tpu.concatenate %494, %495, %496 in 1 : vector<1x1x12x12xf32>, vector<1x1x12x12xf32>, vector<1x1x12x12xf32> -> vector<1x3x12x12xf32>
    %498 = vector.extract_strided_slice %497 {offsets = [0, 0, 0, 0], sizes = [1, 3, 12, 11], strides = [1, 1, 1, 1]} : vector<1x3x12x12xf32> to vector<1x3x12x11xf32>
    %499 = vector.extract_strided_slice %497 {offsets = [0, 0, 0, 1], sizes = [1, 3, 12, 11], strides = [1, 1, 1, 1]} : vector<1x3x12x12xf32> to vector<1x3x12x11xf32>
    %500 = arith.maximumf %498, %499 : vector<1x3x12x11xf32>
    %501 = vector.extract_strided_slice %500 {offsets = [0, 0, 0, 0], sizes = [1, 3, 11, 11], strides = [1, 1, 1, 1]} : vector<1x3x12x11xf32> to vector<1x3x11x11xf32>
    %502 = vector.extract_strided_slice %500 {offsets = [0, 0, 1, 0], sizes = [1, 3, 11, 11], strides = [1, 1, 1, 1]} : vector<1x3x12x11xf32> to vector<1x3x11x11xf32>
    %503 = arith.maximumf %501, %502 : vector<1x3x11x11xf32>
    %504 = vector.extract_strided_slice %503 {offsets = [0, 0, 0, 0], sizes = [1, 3, 11, 1], strides = [1, 1, 1, 1]} : vector<1x3x11x11xf32> to vector<1x3x11x1xf32>
    %505 = vector.extract_strided_slice %503 {offsets = [0, 0, 0, 2], sizes = [1, 3, 11, 1], strides = [1, 1, 1, 1]} : vector<1x3x11x11xf32> to vector<1x3x11x1xf32>
    %506 = vector.extract_strided_slice %503 {offsets = [0, 0, 0, 4], sizes = [1, 3, 11, 1], strides = [1, 1, 1, 1]} : vector<1x3x11x11xf32> to vector<1x3x11x1xf32>
    %507 = vector.extract_strided_slice %503 {offsets = [0, 0, 0, 6], sizes = [1, 3, 11, 1], strides = [1, 1, 1, 1]} : vector<1x3x11x11xf32> to vector<1x3x11x1xf32>
    %508 = vector.extract_strided_slice %503 {offsets = [0, 0, 0, 8], sizes = [1, 3, 11, 1], strides = [1, 1, 1, 1]} : vector<1x3x11x11xf32> to vector<1x3x11x1xf32>
    %509 = vector.extract_strided_slice %503 {offsets = [0, 0, 0, 10], sizes = [1, 3, 11, 1], strides = [1, 1, 1, 1]} : vector<1x3x11x11xf32> to vector<1x3x11x1xf32>
    %510 = tpu.concatenate %504, %505, %506, %507, %508, %509 in 3 : vector<1x3x11x1xf32>, vector<1x3x11x1xf32>, vector<1x3x11x1xf32>, vector<1x3x11x1xf32>, vector<1x3x11x1xf32>, vector<1x3x11x1xf32> -> vector<1x3x11x6xf32>
    %511 = vector.extract_strided_slice %510 {offsets = [0, 0, 0, 0], sizes = [1, 3, 1, 6], strides = [1, 1, 1, 1]} : vector<1x3x11x6xf32> to vector<1x3x1x6xf32>
    %512 = vector.extract_strided_slice %510 {offsets = [0, 0, 2, 0], sizes = [1, 3, 1, 6], strides = [1, 1, 1, 1]} : vector<1x3x11x6xf32> to vector<1x3x1x6xf32>
    %513 = vector.extract_strided_slice %510 {offsets = [0, 0, 4, 0], sizes = [1, 3, 1, 6], strides = [1, 1, 1, 1]} : vector<1x3x11x6xf32> to vector<1x3x1x6xf32>
    %514 = vector.extract_strided_slice %510 {offsets = [0, 0, 6, 0], sizes = [1, 3, 1, 6], strides = [1, 1, 1, 1]} : vector<1x3x11x6xf32> to vector<1x3x1x6xf32>
    %515 = vector.extract_strided_slice %510 {offsets = [0, 0, 8, 0], sizes = [1, 3, 1, 6], strides = [1, 1, 1, 1]} : vector<1x3x11x6xf32> to vector<1x3x1x6xf32>
    %516 = vector.extract_strided_slice %510 {offsets = [0, 0, 10, 0], sizes = [1, 3, 1, 6], strides = [1, 1, 1, 1]} : vector<1x3x11x6xf32> to vector<1x3x1x6xf32>
    %517 = tpu.concatenate %511, %512, %513, %514, %515, %516 in 2 : vector<1x3x1x6xf32>, vector<1x3x1x6xf32>, vector<1x3x1x6xf32>, vector<1x3x1x6xf32>, vector<1x3x1x6xf32>, vector<1x3x1x6xf32> -> vector<1x3x6x6xf32>
    %c0_42 = arith.constant 0 : index
    %c0_43 = arith.constant 0 : index
    %c0_44 = arith.constant 0 : index
    %c0_45 = arith.constant 0 : index
    %518 = vector.load %arg6[%c0_42, %c0_43, %c0_44, %c0_45] : memref<1x3x6x6xf32, #tpu.memory_space<vmem>>, vector<1x3x6x6xf32>
    tpu.vector_store %arg6[%c0_42, %c0_43, %c0_44, %c0_45], %517 {strides = array<i32>} : memref<1x3x6x6xf32, #tpu.memory_space<vmem>>, vector<1x3x6x6xf32>,
    return
  }
  func.func @transform_0(%arg0: i32) -> (i32, i32, i32, i32) {
    %c0_i32 = arith.constant 0 : i32
    %c0_i32_0 = arith.constant 0 : i32
    %c0_i32_1 = arith.constant 0 : i32
    %c0_i32_2 = arith.constant 0 : i32
    return %arg0, %c0_i32, %c0_i32_0, %c0_i32_1 : i32, i32, i32, i32
  }
  func.func @transform_1(%arg0: i32) -> i32 {
    %c0_i32 = arith.constant 0 : i32
    %c0_i32_0 = arith.constant 0 : i32
    return %c0_i32 : i32
  }
  func.func @transform_2(%arg0: i32) -> i32 {
    %c0_i32 = arith.constant 0 : i32
    %c0_i32_0 = arith.constant 0 : i32
    return %c0_i32 : i32
  }
  func.func @transform_3(%arg0: i32) -> i32 {
    %c0_i32 = arith.constant 0 : i32
    %c0_i32_0 = arith.constant 0 : i32
    return %c0_i32 : i32
  }
  func.func @transform_4(%arg0: i32) -> i32 {
    %c0_i32 = arith.constant 0 : i32
    %c0_i32_0 = arith.constant 0 : i32
    return %c0_i32 : i32
  }
  func.func @transform_5(%arg0: i32) -> (i32, i32, i32, i32) {
    %c0_i32 = arith.constant 0 : i32
    %c0_i32_0 = arith.constant 0 : i32
    %c0_i32_1 = arith.constant 0 : i32
    %c0_i32_2 = arith.constant 0 : i32
    return %arg0, %c0_i32, %c0_i32_0, %c0_i32_1 : i32, i32, i32, i32
  }
}

</mosaic_0001>

<bundles_post_ra>
// kernel: tpu_custom_call.1
= control target key start
LH: loop header
LB: loop body
LE: loop exit
PB: predicated region body
PF: predicated region fallthrough
CT: control target
= control target key end

     0   :  { %10 = vsyncpa [#allocation3], 0  ;;  %s3783_s0 = inlined_call_operand.hbm [shape: f32[2,1,16,16], index: 0, kind: input, shape index: {}]   ;;  %s3784_s1 = inlined_call_operand.hbm [shape: f32[27], index: 1, kind: input, shape index: {}]   ;;  %s3785_s2 = inlined_call_operand.vmem [shape: f32[3], index: 2, kind: input, shape index: {}]   ;;  %s3786_s3 = inlined_call_operand.vmem [shape: f32[81], index: 3, kind: input, shape index: {}]   ;;  %s3787_s4 = inlined_call_operand.vmem [shape: f32[3], index: 4, kind: input, shape index: {}]   ;;  %s3788_s5 = inlined_call_operand.vmem [shape: f32[2,3,6,6], index: 5, kind: output, shape index: {}]  }
   0x1   :  { %12 = vsyncpa [#allocation3 + $0x1], 0 }
   0x2   :  { %13 = vsyncpa [#allocation4], 0 }
   0x3   :  { %14 = vsyncpa [#allocation5], 0 }
   0x4   :  { %15 = vsyncpa [#allocation9], 0  ;;  %s2618_s18 = smov 0   ;;  %s2620_s19 = smov 0  }
   0x5   :  { %s2622_s20 = smov 0   ;;  %s2624_s21 = smov 0  }
   0x6 LB: > { %s2637_s22 = sadd.s32 4294967295, %s2575_s21   ;;  %p41_p0 = scmp.ne.s32.totalorder %s2567_s19, %s2563_s18  ;;  %s2575_s21 = sphi %s2624_s21, %s3809_s21   ;;  %s2571_s20 = sphi %s2622_s20, %s3808_s20   ;;  %s2567_s19 = sphi %s2620_s19, %s3807_s19   ;;  %s2563_s18 = sphi %s2618_s18, %s3806_s18  }
   0x7   : > { %p42_p1 = scmp.eq.s32.totalorder %s2637_s22, 0  ;;  %p2222_p2 = scmp.ge.s32.totalorder %s2575_s21, 1 }
   0x8   : > { %p162_p3 = scmp.lt.s32.totalorder %s2575_s21, 3  ;;  %s194_s26 = sshll.u32 %s3786_s3, 4  ;;  %s195_s26 = int_to_ptr.vmem [resolvable:$true] %s194_s26 }
   0x9   : > { %p2645_p4 = por %p42_p1, %p41_p0  ;;  %s174_s30 = sshll.u32 %s3784_s1, 4  ;;  %s175_s30 = int_to_ptr.hbm [resolvable:$true] %s174_s30 }
   0xa   : > { %p2652_p5 = pnand %p2222_p2, %p162_p3  ;;  %s184_s8 = sshll.u32 %s3785_s2, 4  ;;  %s185_s8 = int_to_ptr.vmem [resolvable:$true] %s184_s8 }
   0xb   : > { %s204_s11 = sshll.u32 %s3787_s4, 4  ;;  %s2577_s12 = smov [#allocation8]   ;;  %s205_s11 = int_to_ptr.vmem [resolvable:$true] %s204_s11 }
   0xc   : > { %p2370_p6 = pneg %p2652_p5  ;;  %s2578_s13 = smov [#allocation6]  }
   0xd   : > { %s2579_s14 = smov [#allocation7]   ;;  %s2580_s15 = smov [#allocation10]  }
   0xe   : > { %p2371_p7 = pnand %p2370_p6, %p42_p1  ;;  %s2670_s16 = sadd.s32 1, %s2575_s21  }
   0xf   : > { %s25_s17 = ssub.s32 %s2575_s21, %s2670_s16  ;;  %s28_s18 = sadd.s32 1, %s2571_s20 }
  0x10   : > { %2379 = dma.vmem_to_smem (!%p2371_p7), %s195_s26, 16, %s2577_s12, [#allocation9]  }
  0x11   : > { %2373 = dma.hbm_to_smem (!%p2371_p7), %s175_s30, 16, %s2578_s13, [#allocation4]  }
  0x12   : > { %2376 = dma.vmem_to_smem (!%p2371_p7), %s185_s8, 16, %s2579_s14, [#allocation5]  }
  0x13   : > { %2382 = dma.vmem_to_smem (!%p2371_p7), %s205_s11, 16, %s2580_s15, [#allocation9]  }
  0x14   : > { %p26_p8 = scmp.eq.s32.totalorder %s25_s17, 0  ;;  %p35_p9 = scmp.ne.s32.totalorder %s2571_s20, %s2567_s19 }
  0x15   : > { %p36_p10 = scmp.eq.s32.totalorder %s2575_s21, 0  ;;  %p2391_p12 = scmp.lt.s32.totalorder %s2575_s21, 2 }
  0x16   : > { %s2679_s24 = scalar_select %p26_p8, %s2571_s20, %s28_s18  }
  0x17   : > { %p37_p11 = por %p36_p10, %p35_p9  ;;  %s215_s25 = sand.u32 1, %s2571_s20  }
  0x18   : > { %s2350_s26 = sshll.u32 %s2575_s21, 4  ;;  %s2228_s28 = sshll.u32 %s215_s25, 4 }
  0x19   : > { %s224_s6 = scalar_lea.hbm %s3783_s0, %s2350_s26  ;;  %s219_s8 = scalar_lea.vmem [#allocation2], %s2228_s28 }
  0x1a   : > { %s225_s7 = sshll.u32 %s224_s6, 4  ;;  %s227_s9 = sshll.u32 %s219_s8, 4  ;;  %s226_s7 = int_to_ptr.hbm [resolvable:$true] %s225_s7  ;;  %s228_s9 = int_to_ptr.vmem [resolvable:$true] %s227_s9 }
  0x1b   : > { %p2687_p13 = pnand %p2391_p12, %p37_p11  ;;  %s216_s11 = scalar_lea.sflag [#allocation3], %s215_s25 }
  0x1c   : > { %s2499_s12 = sshra.s32 %s226_s7, 4  ;;  %s2506_s15 = scalar_lea.hbm %s3783_s0, 32  ;;  %s2500_s12 = int_to_ptr.hbm [resolvable:$true] %s2499_s12 }
  0x1d   : > { %s2501_s13 = scalar_lea.hbm %s2500_s12, 16  ;;  %p2503_p2 = pneg %p2687_p13 }
  0x1e   : > { %p2502_p0 = scmp.ne.s32.totalorder %s2500_s12, %s2501_s13  ;;  %p2507_p7 = scmp.lt.s32.totalorder %s2500_s12, %s3783_s0 }
  0x1f   : > { %p2508_p8 = scmp.lt.s32.totalorder %s2506_s15, %s2501_s13 }
  0x20   : > { %p2504_p3 = pnand %p2503_p2, %p2502_p0 }
  0x21   : > { %p2509_p9 = por %p2508_p8, %p2507_p7 }
  0x22   : > { %p2505_p6 = pneg %p2504_p3 }
  0x24   : > { %p2510_p10 = pnand %p2509_p9, %p2505_p6 }
  0x26   : > { %2513 = shalt.err (!%p2510_p10)
}
  0x27   : > { %s2581_s25 = smov 128   ;;  %s2582_s26 = smov 8  }
  0x28   : > { %2386 = dma.hbm_to_vmem [thread:$0]  (!%p2687_p13), %s226_s7, 256, %s228_s9, %s216_s11, %s2581_s25, %s2581_s25, %s2582_s26  }
  0x29   : > { %239 = sbr.rel (%p2652_p5) target bundleno = 930 (0x3a2), region = 40  ;;  %s241_s28 = sand.u32 (!%p2652_p5), 1, %s2567_s19  }
  0x2a   : > { %s2232_s29 = sshll.u32 (!%p2652_p5), %s241_s28, 4  ;;  %s242_s30 = scalar_lea.sflag (!%p2652_p5), [#allocation3], %s241_s28 }
  0x2b   : > { %s245_s6 = scalar_lea.vmem (!%p2652_p5), [#allocation2], %s2232_s29 }
  0x2e   : > { %2546 = dma.done.wait (%p2645_p4), %s242_s30, 256  }
  0x2f   : > { %2548 = vsyncadd (%p2645_p4), %s242_s30, 4294967040 }
  0x30   : > { %2550 = dma.done.wait (%p42_p1), [#allocation4], 16  }
  0x31   : > { %2552 = vsyncadd (%p42_p1), [#allocation4], 4294967280 }
  0x32   : > { %2554 = dma.done.wait (%p42_p1), [#allocation5], 16  }
  0x33   : > { %2556 = vsyncadd (%p42_p1), [#allocation5], 4294967280 }
  0x34   : > { %2558 = dma.done.wait (%p42_p1), [#allocation9], 32  }
  0x35   : > { %2560 = vsyncadd (%p42_p1), [#allocation9], 4294967264 }
  0x36   : > { %271 = sfence }
  0x37   : > { %s2239_s23 = sld [smem:[#allocation6 + $0x2]]  ;;  %v2720_v0 = vld [vmem:[%s245_s6] sm:$0xff]  ;;  %v2724_v5 = vld [vmem:[%s245_s6 + $0x8] sm:$0xff]  ;;  %s2583_s9 = smov 126   ;;  %vm339_vm0 = vcmask 1046528   ;;  %vm387_vm1 = vcmask 1045504  }
  0x38   : > { %s2238_s27 = sld [smem:[#allocation6 + $0x1]]  ;;  %s2584_s11 = smov 127   ;;  %vm2016_vm2 = vcmask 7168   ;;  %vm2023_vm3 = vcmask 15360   ;;  %vm2030_vm4 = vcmask 23552   ;;  %vm2037_vm5 = vcmask 31744  }
  0x39   : > { %s2241_s7 = sld [smem:[#allocation6 + $0x4]]  ;;  %p294_p1 = scmp.lt.s32.totalorder %s2637_s22, 1  ;;  %vm2044_vm6 = vcmask 39936   ;;  %vm2087_vm7 = vcmask 1040384   ;;  %vm2091_vm8 = vcmask 1041408   ;;  %vm2099_vm9 = vcmask 1043456  }
  0x3a   : > { %s2242_s8 = sld [smem:[#allocation6 + $0x5]]  ;;  %vm2095_vm10 = vcmask 1042432   ;;  %vm2103_vm11 = vcmask 1044480   ;;  %vm2107_vm12 = vcmask 46080  }
  0x3b   : > { %s2245_s10 = sld [smem:[#allocation6 + $0x8]]  ;;  %s3811_s22 = smov (!%p294_p1, %s2637_s22), 1 }
  0x3c   : > { %s2244_s12 = sld [smem:[#allocation6 + $0x7]] }
  0x3d   : > { %v320_v1 = vstv %s2239_s23  ;;  %s2247_s13 = sld [smem:[#allocation6 + $0xa]] }
  0x3e   : > { %v321_v2 = vmul.f32 %v320_v1, %v2720_v0  ;;  %v306_v3 = vstv %s2238_s27  ;;  %v322_v11 = vmul.f32 %v320_v1, %v2724_v5  ;;  %s2250_s21 = sld [smem:[#allocation6 + $0xd]] }
  0x3f   : > { %v307_v4 = vmul.f32 %v306_v3, %v2720_v0  ;;  %v348_v6 = vstv %s2241_s7  ;;  %v308_v12 = vmul.f32 %v306_v3, %v2724_v5  ;;  %s2248_s14 = sld [smem:[#allocation6 + $0xb]] }
  0x40   : > { %325 = vrot.lane.b32.xlu1 %v321_v2, %s2583_s9  ;;  %v350_v7 = vmul.f32 %v348_v6, %v2724_v5  ;;  %v349_v8 = vmul.f32 %v348_v6, %v2720_v0  ;;  %v365_v9 = vstv %s2242_s8  ;;  %s2251_s15 = sld [smem:[#allocation6 + $0xe]] }
  0x41   : > { %311 = vrot.lane.b32.xlu0 %v307_v4, %s2584_s11  ;;  %v366_v13 = vmul.f32 %v365_v9, %v2720_v0  ;;  %v367_v14 = vmul.f32 %v365_v9, %v2724_v5  ;;  %v413_v16 = vstv %s2245_s10  ;;  %s2253_s17 = sld [smem:[#allocation6 + $0x10]] }
  0x42   : > { %v354_v10 = vrot.slane %v350_v7, 1  ;;  %v353_v15 = vrot.slane %v349_v8, 1  ;;  %v396_v17 = vstv %s2244_s12  ;;  %v414_v23 = vmul.f32 %v413_v16, %v2720_v0  ;;  %s2254_s18 = sld [smem:[#allocation6 + $0x11]] }
  0x43   : > { %v371_v18 = vrot.slane %v367_v14, 1  ;;  %v370_v19 = vrot.slane %v366_v13, 1  ;;  %v397_v20 = vmul.f32 %v396_v17, %v2720_v0  ;;  %v398_v22 = vmul.f32 %v396_v17, %v2724_v5  ;;  %s2257_s25 = sld [smem:[#allocation6 + $0x13]] }
  0x44   : > { %358 = vrot.lane.b32.xlu2 %v354_v10, %s2584_s11  ;;  %v355_v21 = vsel %vm339_vm0, %v353_v15, %v354_v10  ;;  %v415_v24 = vmul.f32 %v413_v16, %v2724_v5  ;;  %v418_v28 = vrot.slane %v414_v23, 2  ;;  %v440_v32 = vstv %s2247_s13  ;;  %s2260_s26 = sld [smem:[#allocation6 + $0x16]] }
  0x45   : > { %v372_v25 = vsel %vm339_vm0, %v370_v19, %v371_v18  ;;  %v401_v26 = vrot.slane %v397_v20, 2  ;;  %v402_v27 = vrot.slane %v398_v22, 2  ;;  %v481_v33 = vstv %s2250_s21  ;;  %s2258_s28 = sld [smem:[#allocation6 + $0x14]] }
  0x46   : > { %v419_v29 = vrot.slane %v415_v24, 2  ;;  %v442_v34 = vmul.f32 %v440_v32, %v2724_v5  ;;  %v441_v35 = vmul.f32 %v440_v32, %v2720_v0  ;;  %v482_v36 = vmul.f32 %v481_v33, %v2720_v0  ;;  %s2261_s29 = sld [smem:[#allocation6 + $0x17]] }
  0x47   : > { %v403_v30 = vsel %vm387_vm1, %v401_v26, %v402_v27  ;;  %v483_v37 = vmul.f32 %v481_v33, %v2724_v5  ;;  %v454_v38 = vstv %s2248_s14  ;;  %v498_v42 = vstv %s2251_s15  ;;  %s2264_s30 = sld [smem:[#allocation6 + $0x1a]] }
  0x48   : > { %327 = vrot.lane.b32.xlu1 %v322_v11, %s2583_s9  ;;  %v420_v31 = vsel %vm387_vm1, %v418_v28, %v419_v29  ;;  %v486_v39 = vrot.slane %v482_v36, 1  ;;  %v455_v41 = vmul.f32 %v454_v38, %v2720_v0  ;;  %v456_v44 = vmul.f32 %v454_v38, %v2724_v5  ;;  %s2263_s6 = sld [smem:[#allocation6 + $0x19]] }
  0x49   : > { %313 = vrot.lane.b32.xlu0 %v308_v12, %s2584_s11  ;;  %v487_v40 = vrot.slane %v483_v37, 1  ;;  %v499_v45 = vmul.f32 %v498_v42, %v2720_v0  ;;  %v500_v46 = vmul.f32 %v498_v42, %v2724_v5  ;;  %v528_v47 = vstv %s2253_s17  ;;  %s301_s23 = sld [smem:[#allocation6]] }
  0x4a   : > { %v545_v50 = vstv %s2254_s18  ;;  %v529_v51 = vmul.f32 %v528_v47, %v2720_v0  ;;  %v530_v52 = vmul.f32 %v528_v47, %v2724_v5  ;;  %v572_v62 = vstv %s2257_s25  ;;  %s2240_s27 = sld [smem:[#allocation6 + $0x3]] }
  0x4b   : > { %v488_v43 = vsel %vm339_vm0, %v486_v39, %v487_v40  ;;  %v504_v48 = vrot.slane %v500_v46, 1  ;;  %v503_v49 = vrot.slane %v499_v45, 1  ;;  %v546_v53 = vmul.f32 %v545_v50, %v2720_v0  ;;  %s2243_s7 = sld [smem:[#allocation6 + $0x6]] }
  0x4c   : > { %356 = vrot.lane.b32.xlu2 %v355_v21, %s2584_s11  ;;  %v547_v54 = vmul.f32 %v545_v50, %v2724_v5  ;;  %v533_v56 = vrot.slane %v529_v51, 2  ;;  %v534_v57 = vrot.slane %v530_v52, 2  ;;  %v613_v63 = vstv %s2260_s26  ;;  %s429_s8 = sld [smem:[#allocation7]] }
  0x4d   : > { %v505_v55 = vsel %vm339_vm0, %v503_v49, %v504_v48  ;;  %v550_v58 = vrot.slane %v546_v53, 2  ;;  %v574_v1 = vmul.f32 %v572_v62, %v2724_v5  ;;  %v573_v2 = vmul.f32 %v572_v62, %v2720_v0  ;;  %s2816_s10 = sld [smem:[#allocation8 + $0x2]] }
  0x4e   : > { %v551_v59 = vrot.slane %v547_v54, 2  ;;  %v535_v60 = vsel %vm387_vm1, %v533_v56, %v534_v57  ;;  %v614_v3 = vmul.f32 %v613_v63, %v2720_v0  ;;  %v615_v4 = vmul.f32 %v613_v63, %v2724_v5  ;;  %s2266_s12 = sld [smem:[#allocation8 + $0x1]] }
  0x4f   : > { %v586_v6 = vstv %s2258_s28  ;;  %v630_v10 = vstv %s2261_s29  ;;  %v677_v17 = vstv %s2264_s30  ;;  %s2246_s13 = sld [smem:[#allocation6 + $0x9]] }
  0x50   : > { %375 = vrot.lane.b32.xlu1 %v371_v18, %s2583_s9  ;;  %v552_v61 = vsel %vm387_vm1, %v550_v58, %v551_v59  ;;  %v618_v7 = vrot.slane %v614_v3, 1  ;;  %v619_v8 = vrot.slane %v615_v4, 1  ;;  %v587_v9 = vmul.f32 %v586_v6, %v2720_v0  ;;  %s2249_s21 = sld [smem:[#allocation6 + $0xc]] }
  0x51   : > { %373 = vrot.lane.b32.xlu0 %v372_v25, %s2583_s9  ;;  %v588_v11 = vmul.f32 %v586_v6, %v2724_v5  ;;  %v631_v13 = vmul.f32 %v630_v10, %v2720_v0  ;;  %v632_v14 = vmul.f32 %v630_v10, %v2724_v5  ;;  %v660_v18 = vstv %s2263_s6  ;;  %s2252_s14 = sld [smem:[#allocation6 + $0xf]] }
  0x52   : > { %v620_v12 = vsel %vm339_vm0, %v618_v7, %v619_v8  ;;  %v678_v19 = vmul.f32 %v677_v17, %v2720_v0  ;;  %v679_v20 = vmul.f32 %v677_v17, %v2724_v5  ;;  %v661_v22 = vmul.f32 %v660_v18, %v2720_v0  ;;  %s2838_s15 = sld [smem:[#allocation7 + $0x1]] }
  0x53   : > { %v635_v15 = vrot.slane %v631_v13, 1  ;;  %v636_v16 = vrot.slane %v632_v14, 1  ;;  %v662_v23 = vmul.f32 %v660_v18, %v2724_v5  ;;  %v334_v32 = vstv %s2240_s27  ;;  %s2841_s17 = sld [smem:[#allocation8 + $0x4]] }
  0x54   : > { %404 = vrot.lane.b32.xlu2 %v403_v30, %s2584_s11  ;;  %v682_v24 = vrot.slane %v678_v19, 2  ;;  %v683_v25 = vrot.slane %v679_v20, 2  ;;  %v336_v37 = vmul.f32 %v334_v32, %v2724_v5  ;;  %v335_v38 = vmul.f32 %v334_v32, %v2720_v0  ;;  %s2843_s18 = sld [smem:[#allocation8 + $0xb]] }
  0x55   : > { %v637_v21 = vsel %vm339_vm0, %v635_v15, %v636_v16  ;;  %v666_v26 = vrot.slane %v662_v23, 2  ;;  %v430_v4 = vstv %s429_s8  ;;  %v718_v14 = vstv %s2816_s10  ;;  %s2845_s25 = sld [smem:[#allocation8 + $0xa]] }
  0x56   : > { %v684_v28 = vsel %vm387_vm1, %v682_v24, %v683_v25  ;;  %v704_v15 = vstv %s2266_s12  ;;  %v436_v18 = vstv %s2246_s13  ;;  %v468_v23 = vstv %s2249_s21  ;;  %s2847_s26 = sld [smem:[#allocation8 + $0x5]] }
  0x57   : > { %v515_v32 = vstv %s2252_s14  ;;  %s2849_s28 = sld [smem:[#allocation6 + $0x15]] }
  0x58   : > { %421 = vrot.lane.b32.xlu1 %v420_v31, %s2583_s9  ;;  %v302_v31 = vstv %s301_s23  ;;  %s2851_s29 = sld [smem:[#allocation6 + $0x12]] }
  0x59   : > { %406 = vrot.lane.b32.xlu0 %v402_v27, %s2584_s11  ;;  %v665_v27 = vrot.slane %v661_v22, 2  ;;  %v304_v42 = vmul.f32 %v302_v31, %v2724_v5  ;;  %s2854_s30 = sld [smem:[#allocation8 + $0x8]] }
  0x5a   : > { %s2856_s6 = sld [smem:[#allocation8 + $0x7]] }
  0x5b   : > { %s2858_s23 = sld [smem:[#allocation8 + $0xe]] }
  0x5c   : > { %423 = vrot.lane.b32.xlu2 %v419_v29, %s2583_s9  ;;  %v667_v29 = vsel %vm387_vm1, %v665_v27, %v666_v26  ;;  %v469_v27 = vmul.f32 %v468_v23, %v2720_v0  ;;  %s2862_s27 = sld [smem:[#allocation8 + $0x28]] }
  0x5d   : > { %s2869_s8 = sld [smem:[#allocation8 + $0xc]] }
  0x5e   : > { %s2874_s10 = sld [smem:[#allocation8 + $0x2b]] }
  0x5f   : > { %s2881_s12 = sld [smem:[#allocation8 + $0x2c]] }
  0x60   : > { %447 = vrot.lane.b32.xlu1 %v442_v34, %s2584_s11  ;;  %s2895_s13 = sld [smem:[#allocation8 + $0xf]] }
  0x61   : > { %445 = vrot.lane.b32.xlu0 %v441_v35, %s2584_s11  ;;  %v303_v35 = vmul.f32 %v302_v31, %v2720_v0  ;;  %s2909_s21 = sld [smem:[#allocation6 + $0x18]] }
  0x62   : > { %s2941_s14 = sld [smem:[#allocation8 + $0xd]] }
  0x64   : > { %459 = vrot.lane.b32.xlu2 %v455_v41, %s2583_s9  ;;  %v340_v41 = vrot.slane %v335_v38, 1 }
  0x68   : > { %489 = vrot.lane.b32.xlu1 %v488_v43, %s2584_s11  ;;  %v382_v43 = vstv %s2243_s7  ;;  %s2866_s7 = sld [smem:[#allocation8 + $0x29]] }
  0x69   : > { %461 = vrot.lane.b32.xlu0 %v456_v44, %s2583_s9  ;;  %v383_v49 = vmul.f32 %v382_v43, %v2720_v0  ;;  %v384_v50 = vmul.f32 %v382_v43, %v2724_v5 }
  0x6b   : > { %v388_v54 = vrot.slane %v383_v49, 2 }
  0x6c   : > { %491 = vrot.lane.b32.xlu2 %v487_v40, %s2584_s11  ;;  %v341_v40 = vrot.slane %v336_v37, 1 }
  0x6e   : > { %v342_v47 = vsel %vm339_vm0, %v340_v41, %v341_v40 }
  0x70   : > { %508 = vrot.lane.b32.xlu1 %v504_v48, %s2583_s9 }
  0x71   : > { %506 = vrot.lane.b32.xlu0 %v505_v55, %s2583_s9  ;;  %v389_v55 = vrot.slane %v384_v50, 2 }
  0x74   : > { %536 = vrot.lane.b32.xlu2 %v535_v60, %s2584_s11 }
  0x78   : > { %553 = vrot.lane.b32.xlu1 %v552_v61, %s2583_s9  ;;  %v390_v61 = vsel %vm387_vm1, %v388_v54, %v389_v55 }
  0x79   : > { %538 = vrot.lane.b32.xlu0 %v534_v57, %s2584_s11 }
  0x7c   : > { %555 = vrot.lane.b32.xlu2 %v551_v59, %s2583_s9 }
  0x80   : > { %579 = vrot.lane.b32.xlu1 %v574_v1, %s2584_s11 }
  0x81   : > { %577 = vrot.lane.b32.xlu0 %v573_v2, %s2584_s11 }
  0x84   : > { %591 = vrot.lane.b32.xlu2 %v587_v9, %s2583_s9 }
  0x88   : > { %621 = vrot.lane.b32.xlu1 %v620_v12, %s2584_s11 }
  0x89   : > { %593 = vrot.lane.b32.xlu0 %v588_v11, %s2583_s9 }
  0x8c   : > { %623 = vrot.lane.b32.xlu2 %v619_v8, %s2584_s11 }
  0x90   : > { %640 = vrot.lane.b32.xlu1 %v636_v16, %s2583_s9 }
  0x91   : > { %638 = vrot.lane.b32.xlu0 %v637_v21, %s2583_s9 }
  0x94   : > { %668 = vrot.lane.b32.xlu2 %v667_v29, %s2584_s11  ;;  %v438_v29 = vmul.f32 %v436_v18, %v2724_v5 }
  0x98   : > { %685 = vrot.lane.b32.xlu1 %v684_v28, %s2583_s9  ;;  %v470_v28 = vmul.f32 %v468_v23, %v2724_v5 }
  0x99   : > { %670 = vrot.lane.b32.xlu0 %v666_v26, %s2584_s11 }
  0x9c   : > { %687 = vrot.lane.b32.xlu2 %v683_v25, %s2583_s9  ;;  %v437_v25 = vmul.f32 %v436_v18, %v2720_v0 }
  0x9e   : > { %v359_v30 = vpop.permute.xlu2 %358 }
  0xa6   : > { %v357_v33 = vpop.permute.xlu2 %356 }
  0xae   : > { %v405_v44 = vpop.permute.xlu2 %404 }
  0xb2   : > { %v326_v34 = vpop.permute.xlu1 %325 }
  0xb3   : > { %v312_v36 = vpop.permute.xlu0 %311 }
  0xb4   : > { %v317_v39 = vadd.f32 %v312_v36, %v303_v35 }
  0xb6   : > { %v331_v45 = vadd.f32 %v326_v34, %v317_v39  ;;  %v424_v62 = vpop.permute.xlu2 %423  ;;  %v474_v34 = vrot.slane %v470_v28, 1  ;;  %v516_v39 = vmul.f32 %v515_v32, %v2720_v0 }
  0xb8   : > { %v345_v52 = vadd.f32 %v342_v47, %v331_v45 }
  0xba   : > { %v328_v46 = vpop.permute.xlu1 %327  ;;  %v362_v57 = vadd.f32 %v357_v33, %v345_v52  ;;  %v473_v33 = vrot.slane %v469_v27, 1 }
  0xbb   : > { %v314_v48 = vpop.permute.xlu0 %313 }
  0xbc   : > { %v318_v51 = vadd.f32 %v314_v48, %v304_v42  ;;  %v475_v43 = vsel %vm339_vm0, %v473_v33, %v474_v34  ;;  %v1261_v33 = vstv %s2862_s27  ;;  %s3102_s27 = sld [smem:[#allocation8 + $0x2a]] }
  0xbe   : > { %v332_v53 = vadd.f32 %v328_v46, %v318_v51  ;;  %v460_v12 = vpop.permute.xlu2 %459 }
  0xc0   : > { %v346_v56 = vadd.f32 %v341_v40, %v332_v53  ;;  %v517_v40 = vmul.f32 %v515_v32, %v2724_v5 }
  0xc2   : > { %v376_v58 = vpop.permute.xlu1 %375  ;;  %v363_v59 = vadd.f32 %v359_v30, %v346_v56  ;;  %v521_v45 = vrot.slane %v517_v40, 2 }
  0xc3   : > { %v374_v60 = vpop.permute.xlu0 %373 }
  0xc4   : > { %v379_v63 = vadd.f32 %v374_v60, %v362_v57  ;;  %v380_v1 = vadd.f32 %v376_v58, %v363_v59  ;;  %v562_v58 = vstv %s2838_s15  ;;  %s3029_s15 = sld [smem:[#allocation8 + $0x10]] }
  0xc6   : > { %v393_v2 = vadd.f32 %v390_v61, %v379_v63  ;;  %v394_v7 = vadd.f32 %v389_v55, %v380_v1  ;;  %v492_v30 = vpop.permute.xlu2 %491 }
  0xc8   : > { %v410_v3 = vadd.f32 %v405_v44, %v393_v2  ;;  %v520_v44 = vrot.slane %v516_v39, 2 }
  0xca   : > { %v422_v6 = vpop.permute.xlu1 %421  ;;  %v522_v52 = vsel %vm387_vm1, %v520_v44, %v521_v45 }
  0xcb   : > { %v427_v8 = vadd.f32 %v422_v6, %v410_v3  ;;  %v407_v9 = vpop.permute.xlu0 %406  ;;  %v832_v6 = vstv %s2845_s25  ;;  %s3056_s25 = sld [smem:[#allocation8 + $0x44]] }
  0xcc   : > { %v411_v10 = vadd.f32 %v407_v9, %v394_v7  ;;  %v600_v9 = vstv %s2849_s28  ;;  %s3074_s28 = sld [smem:[#allocation8 + $0x13]] }
  0xcd   : > { %v431_v11 = vadd.f32 %v430_v4, %v427_v8 }
  0xce   : > { %v428_v13 = vadd.f32 %v424_v62, %v411_v10  ;;  %v537_v48 = vpop.permute.xlu2 %536 }
  0xcf   : > { %v2819_v16 = vmax.f32 %v431_v11, 0.0 }
  0xd0   : > { %v432_v17 = vadd.f32 %v430_v4, %v428_v13  ;;  %v846_v4 = vstv %s2843_s18  ;;  %s3054_s18 = sld [smem:[#allocation8 + $0x43]] }
  0xd1   : > { %v719_v19 = vmul.f32 %v718_v14, %v2819_v16  ;;  %v705_v20 = vmul.f32 %v704_v15, %v2819_v16 }
  0xd2   : > { %v2823_v21 = vmax.f32 %v432_v17, 0.0  ;;  %v448_v22 = vpop.permute.xlu1 %447  ;;  %v809_v17 = vstv %s2854_s30  ;;  %s3085_s30 = sld [smem:[#allocation8 + $0x46]] }
  0xd3   : > { %v446_v24 = vpop.permute.xlu0 %445  ;;  %723 = vrot.lane.b32.xlu2 %v719_v19, %s2583_s9  ;;  %709 = vrot.lane.b32.xlu0 %v705_v20, %s2584_s11  ;;  %v452_v36 = vadd.f32 %v448_v22, %v438_v29  ;;  %v792_v19 = vstv %s2856_s6  ;;  %v601_v20 = vmul.f32 %v600_v9, %v2720_v0  ;;  %v2893_v22 = vmul.f32 %v600_v9, %v2724_v5  ;;  %s3090_s6 = sld [smem:[#allocation8 + $0x47]] }
  0xd4   : > { %v706_v26 = vmul.f32 %v704_v15, %v2823_v21  ;;  %v451_v31 = vadd.f32 %v446_v24, %v437_v25  ;;  %v720_v35 = vmul.f32 %v718_v14, %v2823_v21  ;;  %v745_v14 = vstv %s2841_s17  ;;  %s3049_s17 = sld [smem:[#allocation7 + $0x2]] }
  0xd5   : > { %v762_v15 = vstv %s2847_s26  ;;  %v2888_v18 = vmul.f32 %v745_v14, %v2823_v21  ;;  %v2907_v28 = vmul.f32 %v809_v17, %v2823_v21  ;;  %v2914_v29 = vmul.f32 %v792_v19, %v2823_v21  ;;  %s3059_s26 = sld [smem:[#allocation8 + $0x11]] }
  0xd6   : > { %711 = vrot.lane.b32.xlu1 %v706_v26, %s2584_s11  ;;  %v465_v41 = vadd.f32 %v460_v12, %v451_v31  ;;  %v556_v63 = vpop.permute.xlu2 %555  ;;  %v568_v12 = vstv %s2851_s29  ;;  %v2901_v24 = vmul.f32 %v762_v15, %v2823_v21  ;;  %v605_v31 = vrot.slane %v601_v20, 1  ;;  %s3078_s29 = sld [smem:[#allocation8 + $0x14]] }
  0xd7   : > { %v569_v25 = vmul.f32 %v568_v12, %v2720_v0  ;;  %v606_v32 = vrot.slane %v2893_v22, 1  ;;  %v570_v40 = vmul.f32 %v568_v12, %v2724_v5  ;;  %v793_v22 = vmul.f32 %v792_v19, %v2819_v16 }
  0xd8   : > { %v478_v46 = vadd.f32 %v475_v43, %v465_v41  ;;  %v798_v41 = vrot.slane %v2914_v29, 2 }
  0xd9   : > { %v797_v19 = vrot.slane %v793_v22, 2 }
  0xda   : > { %v490_v37 = vpop.permute.xlu1 %489 }
  0xdb   : > { %v462_v38 = vpop.permute.xlu0 %461  ;;  %725 = vrot.lane.b32.xlu0 %v720_v35, %s2583_s9  ;;  %v495_v49 = vadd.f32 %v490_v37, %v478_v46  ;;  %v751_v35 = vrot.slane %v2888_v18, 1  ;;  %v920_v18 = vstv %s3029_s15  ;;  %s3228_s15 = sld [smem:[#allocation8]] }
  0xdc   : > { %v466_v42 = vadd.f32 %v462_v38, %v452_v36  ;;  %v768_v36 = vrot.slane %v2901_v24, 1  ;;  %v815_v38 = vrot.slane %v2907_v28, 2 }
  0xde   : > { %v479_v47 = vadd.f32 %v474_v34, %v466_v42  ;;  %v1278_v34 = vstv %s2866_s7  ;;  %v860_v42 = vstv %s2869_s8  ;;  %v592_v43 = vpop.permute.xlu2 %591  ;;  %s3111_s7 = sld [smem:[#allocation8 + $0x17]] }
  0xdf   : > { %s3127_s8 = sld [smem:[#allocation8 + $0x16]] }
  0xe0   : > { %v496_v53 = vadd.f32 %v492_v30, %v479_v47  ;;  %v890_v30 = vstv %s2858_s23  ;;  %v1308_v47 = vstv %s2874_s10  ;;  %s3098_s23 = sld [smem:[#allocation8 + $0x27]] }
  0xe1   : > { %s3139_s10 = sld [smem:[#allocation8 + $0x42]] }
  0xe2   : > { %v509_v50 = vpop.permute.xlu1 %508 }
  0xe3   : > { %v507_v51 = vpop.permute.xlu0 %506  ;;  %v513_v55 = vadd.f32 %v509_v50, %v496_v53  ;;  %v1325_v50 = vstv %s2881_s12  ;;  %v647_v53 = vstv %s2909_s21  ;;  %s3147_s12 = sld [smem:[#allocation8 + $0x19]] }
  0xe4   : > { %v512_v54 = vadd.f32 %v507_v51, %v495_v49  ;;  %v907_v51 = vstv %s2895_s13  ;;  %s3160_s13 = sld [smem:[#allocation8 + $0x45]] }
  0xe5   : > { %v526_v60 = vadd.f32 %v521_v45, %v513_v55  ;;  %s2291_s21 = sld [smem:[#allocation8 + $0x1a]] }
  0xe6   : > { %v525_v56 = vadd.f32 %v522_v52, %v512_v54 }
  0xe8   : > { %v542_v57 = vadd.f32 %v537_v48, %v525_v56  ;;  %v607_v48 = vsel %vm339_vm0, %v605_v31, %v606_v32  ;;  %v649_v31 = vmul.f32 %v647_v53, %v2724_v5 }
  0xea   : > { %v554_v59 = vpop.permute.xlu1 %553 }
  0xeb   : > { %v559_v61 = vadd.f32 %v554_v59, %v542_v57  ;;  %v539_v62 = vpop.permute.xlu0 %538 }
  0xec   : > { %v543_v1 = vadd.f32 %v539_v62, %v526_v60 }
  0xed   : > { %v563_v2 = vadd.f32 %v562_v58, %v559_v61 }
  0xee   : > { %v560_v3 = vadd.f32 %v556_v63, %v543_v1 }
  0xef   : > { %v2864_v7 = vmax.f32 %v563_v2, 0.0 }
  0xf0   : > { %v564_v8 = vadd.f32 %v562_v58, %v560_v3 }
  0xf1   : > { %v847_v10 = vmul.f32 %v846_v4, %v2864_v7  ;;  %v833_v11 = vmul.f32 %v832_v6, %v2864_v7  ;;  %v1262_v44 = vmul.f32 %v1261_v33, %v2864_v7  ;;  %v1279_v46 = vmul.f32 %v1278_v34, %v2864_v7 }
  0xf2   : > { %v2876_v13 = vmax.f32 %v564_v8, 0.0  ;;  %v580_v27 = vpop.permute.xlu1 %579  ;;  %v1309_v58 = vmul.f32 %v1308_v47, %v2864_v7  ;;  %v1326_v1 = vmul.f32 %v1325_v50, %v2864_v7 }
  0xf3   : > { %851 = vrot.lane.b32.xlu2 %v847_v10, %s2583_s9  ;;  %837 = vrot.lane.b32.xlu0 %v833_v11, %s2584_s11  ;;  %v578_v26 = vpop.permute.xlu0 %577  ;;  %v1266_v55 = vrot.slane %v1262_v44, 1  ;;  %v1283_v56 = vrot.slane %v1279_v46, 1  ;;  %v584_v3 = vadd.f32 %v580_v27, %v570_v40  ;;  %v648_v27 = vmul.f32 %v647_v53, %v2720_v0  ;;  %v624_v40 = vpop.permute.xlu2 %623 }
  0xf4   : > { %v834_v23 = vmul.f32 %v832_v6, %v2876_v13  ;;  %v583_v37 = vadd.f32 %v578_v26, %v569_v25  ;;  %v848_v39 = vmul.f32 %v846_v4, %v2876_v13  ;;  %v2930_v45 = vmul.f32 %v1261_v33, %v2876_v13 }
  0xf5   : > { %v2944_v49 = vmul.f32 %v1278_v34, %v2876_v13  ;;  %v2953_v59 = vmul.f32 %v1308_v47, %v2876_v13  ;;  %v2964_v63 = vmul.f32 %v860_v42, %v2876_v13  ;;  %v2968_v2 = vmul.f32 %v1325_v50, %v2876_v13 }
  0xf6   : > { %839 = vrot.lane.b32.xlu1 %v834_v23, %s2584_s11  ;;  %v597_v52 = vadd.f32 %v592_v43, %v583_v37  ;;  %v1267_v54 = vrot.slane %v2930_v45, 1  ;;  %v1313_v6 = vrot.slane %v1309_v58, 2  ;;  %v892_v9 = vmul.f32 %v890_v30, %v2876_v13 }
  0xf7   : > { %v1284_v57 = vrot.slane %v2944_v49, 1  ;;  %v1314_v8 = vrot.slane %v2953_v59, 2  ;;  %v1331_v11 = vrot.slane %v2968_v2, 2  ;;  %v1330_v12 = vrot.slane %v1326_v1, 2 }
  0xf8   : > { %v2961_v62 = vsel %vm339_vm0, %v1266_v55, %v1267_v54  ;;  %v610_v10 = vadd.f32 %v607_v48, %v597_v52  ;;  %v908_v23 = vmul.f32 %v907_v51, %v2864_v7  ;;  %v2987_v25 = vmul.f32 %v907_v51, %v2876_v13 }
  0xf9   : > { %v2973_v4 = vsel %vm339_vm0, %v1283_v56, %v1284_v57  ;;  %v2983_v20 = vsel %vm387_vm1, %v1313_v6, %v1314_v8  ;;  %v861_v26 = vmul.f32 %v860_v42, %v2864_v7  ;;  %v866_v33 = vrot.slane %v2964_v63, 1 }
  0xfa   : > { %v622_v61 = vpop.permute.xlu1 %621  ;;  %v763_v34 = vmul.f32 %v762_v15, %v2819_v16  ;;  %v3006_v0 = vsel %vm387_vm1, %v1330_v12, %v1331_v11  ;;  %v896_v5 = vrot.slane %v892_v9, 1  ;;  %v912_v42 = vrot.slane %v908_v23, 2 }
  0xfb   : > { %755 = vrot.lane.b32.xlu2 %v751_v35, %s2584_s11  ;;  %853 = vrot.lane.b32.xlu0 %v848_v39, %s2583_s9  ;;  %v594_v60 = vpop.permute.xlu0 %593  ;;  %v873_v39 = vstv %s2941_s14  ;;  %v913_v15 = vrot.slane %v2987_v25, 2  ;;  %v865_v43 = vrot.slane %v861_v26, 1  ;;  %v627_v44 = vadd.f32 %v622_v61, %v610_v10  ;;  %v669_v9 = vpop.permute.xlu2 %668  ;;  %s3226_s14 = sld [smem:[#allocation8 + $0x1c]] }
  0xfc   : > { %v598_v37 = vadd.f32 %v594_v60, %v584_v3  ;;  %v3010_v46 = vmul.f32 %v873_v39, %v2876_v13  ;;  %v652_v47 = vrot.slane %v648_v27, 2  ;;  %v653_v48 = vrot.slane %v649_v31, 2 }
  0xfd   : > { %v3016_v50 = vsel %vm339_vm0, %v865_v43, %v866_v33  ;;  %v3021_v51 = vsel %vm387_vm1, %v912_v42, %v913_v15  ;;  %v746_v52 = vmul.f32 %v745_v14, %v2819_v16  ;;  %v767_v55 = vrot.slane %v763_v34, 1 }
  0xfe   : > { %772 = vrot.lane.b32.xlu1 %v768_v36, %s2583_s9  ;;  %v611_v53 = vadd.f32 %v606_v32, %v598_v37  ;;  %v879_v60 = vrot.slane %v3010_v46, 1  ;;  %v654_v3 = vsel %vm387_vm1, %v652_v47, %v653_v48  ;;  %v891_v32 = vmul.f32 %v890_v30, %v2864_v7 }
  0xff   : > { %v769_v1 = vsel %vm339_vm0, %v767_v55, %v768_v36  ;;  %v750_v14 = vrot.slane %v746_v52, 1  ;;  %v810_v10 = vmul.f32 %v809_v17, %v2819_v16  ;;  %v922_v17 = vmul.f32 %v920_v18, %v2876_v13 }
 0x100   : > { %v628_v6 = vadd.f32 %v624_v40, %v611_v53  ;;  %v895_v23 = vrot.slane %v891_v32, 1  ;;  %v921_v40 = vmul.f32 %v920_v18, %v2864_v7  ;;  %v874_v43 = vmul.f32 %v873_v39, %v2864_v7 }
 0x101   : > { %v752_v24 = vsel %vm339_vm0, %v750_v14, %v751_v35  ;;  %v799_v35 = vsel %vm387_vm1, %v797_v19, %v798_v41  ;;  %v814_v31 = vrot.slane %v810_v10, 2  ;;  %v926_v42 = vrot.slane %v922_v17, 2 }
 0x102   : > { %v641_v58 = vpop.permute.xlu1 %640  ;;  %v897_v26 = vsel %vm339_vm0, %v895_v23, %v896_v5  ;;  %v1649_v47 = vstv %s3054_s18  ;;  %v925_v52 = vrot.slane %v921_v40, 2  ;;  %v1666_v53 = vstv %s3056_s25  ;;  %s2297_s18 = sld [smem:[#allocation8 + $0x20]] }
 0x103   : > { %819 = vrot.lane.b32.xlu2 %v815_v38, %s2583_s9  ;;  %802 = vrot.lane.b32.xlu0 %v798_v41, %s2584_s11  ;;  %v639_v56 = vpop.permute.xlu0 %638  ;;  %v645_v12 = vadd.f32 %v641_v58, %v628_v6  ;;  %v816_v29 = vsel %vm387_vm1, %v814_v31, %v815_v38  ;;  %v3081_v28 = vmul.f32 %v1649_v47, %v2876_v13  ;;  %v937_v55 = vstv %s3059_s26  ;;  %s2296_s25 = sld [smem:[#allocation8 + $0x1f]] }
 0x104   : > { %v644_v61 = vadd.f32 %v639_v56, %v627_v44  ;;  %v927_v56 = vsel %vm387_vm1, %v925_v52, %v926_v42  ;;  %v939_v58 = vmul.f32 %v937_v55, %v2876_v13  ;;  %v1650_v39 = vmul.f32 %v1649_v47, %v2864_v7  ;;  %s3243_s26 = sld [smem:[#allocation8 + $0x3]] }
 0x105   : > { %v658_v34 = vadd.f32 %v653_v48, %v645_v12  ;;  %v688_v48 = vpop.permute.xlu2 %687  ;;  %v3096_v6 = vmul.f32 %v1666_v53, %v2876_v13  ;;  %v938_v14 = vmul.f32 %v937_v55, %v2864_v7  ;;  %v1655_v22 = vrot.slane %v3081_v28, 1 }
 0x106   : > { %900 = vrot.lane.b32.xlu1 %v896_v5, %s2583_s9  ;;  %v657_v36 = vadd.f32 %v654_v3, %v644_v61  ;;  %v694_v5 = vstv %s3049_s17  ;;  %v1667_v3 = vmul.f32 %v1666_v53, %v2864_v7  ;;  %v1654_v10 = vrot.slane %v1650_v39, 1  ;;  %s2294_s17 = sld [smem:[#allocation8 + $0x1d]] }
 0x107   : > { %v3794_v23 = vrot.slane %v3096_v6, 1  ;;  %v1018_v55 = vstv %s3111_s7  ;;  %s3311_s7 = sld [smem:[#allocation8 + $0x2e]] }
 0x108   : > { %v674_v30 = vadd.f32 %v669_v9, %v657_v36  ;;  %v943_v36 = vrot.slane %v939_v58, 2  ;;  %v960_v9 = vstv %s3074_s28  ;;  %v1671_v19 = vrot.slane %v1667_v3, 1  ;;  %s2299_s28 = sld [smem:[#allocation8 + $0x22]] }
 0x109   : > { %v3117_v46 = vsel %vm339_vm0, %v1654_v10, %v1655_v22  ;;  %v1001_v10 = vstv %s3127_s8  ;;  %s2312_s8 = sld [smem:[#allocation8 + $0x2f]] }
 0x10a   : > { %v686_v27 = vpop.permute.xlu1 %685  ;;  %v3123_v18 = vsel %vm339_vm0, %v1671_v19, %v3794_v23 }
 0x10b   : > { %883 = vrot.lane.b32.xlu2 %v879_v60, %s2584_s11  ;;  %770 = vrot.lane.b32.xlu0 %v769_v1, %s2583_s9  ;;  %v671_v37 = vpop.permute.xlu0 %670  ;;  %v691_v41 = vadd.f32 %v686_v27, %v674_v30  ;;  %v878_v1 = vrot.slane %v874_v43, 1  ;;  %v942_v30 = vrot.slane %v938_v14, 2  ;;  %v1696_v27 = vstv %s3085_s30  ;;  %s2302_s30 = sld [smem:[#allocation8 + $0x25]] }
 0x10c   : > { %v675_v44 = vadd.f32 %v671_v37, %v658_v34  ;;  %v1697_v31 = vmul.f32 %v1696_v27, %v2864_v7  ;;  %v3136_v34 = vmul.f32 %v1696_v27, %v2876_v13  ;;  %v1713_v37 = vstv %s3090_s6  ;;  %s2303_s6 = sld [smem:[#allocation8 + $0x26]] }
 0x10d   : > { %v695_v38 = vadd.f32 %v694_v5, %v691_v41  ;;  %v1714_v40 = vmul.f32 %v1713_v37, %v2864_v7  ;;  %v1248_v41 = vstv %s3098_s23  ;;  %s3289_s23 = sld [smem:[#allocation8 + $0x6]] }
 0x10e   : > { %753 = vrot.lane.b32.xlu1 %v752_v24, %s2584_s11  ;;  %v692_v61 = vadd.f32 %v688_v48, %v675_v44  ;;  %v880_v24 = vsel %vm339_vm0, %v878_v1, %v879_v60  ;;  %v3795_v43 = vrot.slane %v3136_v34, 2  ;;  %v1249_v44 = vmul.f32 %v1248_v41, %v2864_v7 }
 0x10f   : > { %v3104_v32 = vmax.f32 %v695_v38, 0.0  ;;  %v3152_v47 = vmul.f32 %v1248_v41, %v2876_v13  ;;  %v1718_v52 = vrot.slane %v1714_v40, 2 }
 0x110   : > { %v696_v12 = vadd.f32 %v694_v5, %v692_v61  ;;  %v1295_v5 = vstv %s3102_s27  ;;  %v1253_v58 = vrot.slane %v1249_v44, 1  ;;  %s3300_s27 = sld [smem:[#allocation8 + $0x9]] }
 0x111   : > { %v961_v60 = vmul.f32 %v960_v9, %v3104_v32  ;;  %v1296_v53 = vmul.f32 %v1295_v5, %v2864_v7  ;;  %v3158_v38 = vmul.f32 %v1295_v5, %v2876_v13  ;;  %v3792_v39 = vrot.slane %v3152_v47, 1 }
 0x112   : > { %v3130_v17 = vmax.f32 %v696_v12, 0.0  ;;  %v1019_v12 = vmul.f32 %v1018_v55, %v3104_v32  ;;  %v1048_v5 = vstv %s3147_s12  ;;  %s3335_s12 = sld [smem:[#allocation8 + $0x31]] }
 0x113   : > { %800 = vrot.lane.b32.xlu2 %v799_v35, %s2584_s11  ;;  %898 = vrot.lane.b32.xlu0 %v897_v26, %s2583_s9  ;;  %v944_v35 = vsel %vm387_vm1, %v942_v30, %v943_v36  ;;  %v974_v26 = vstv %s3078_s29  ;;  %v1300_v1 = vrot.slane %v1296_v53, 2  ;;  %v3791_v3 = vrot.slane %v3158_v38, 2  ;;  %s2300_s29 = sld [smem:[#allocation8 + $0x23]] }
 0x114   : > { %v975_v14 = vmul.f32 %v974_v26, %v3104_v32  ;;  %v1020_v19 = vmul.f32 %v1018_v55, %v3130_v17  ;;  %v1003_v27 = vmul.f32 %v1001_v10, %v3130_v17  ;;  %v1023_v40 = vrot.slane %v1019_v12, 1 }
 0x115   : > { %v3188_v30 = vsel %vm387_vm1, %v1300_v1, %v3791_v3  ;;  %v1049_v1 = vmul.f32 %v1048_v5, %v3104_v32 }
 0x116   : > { %817 = vrot.lane.b32.xlu1 %v816_v29, %s2583_s9  ;;  %v3143_v29 = vmul.f32 %v1713_v37, %v2876_v13  ;;  %v1024_v41 = vrot.slane %v1020_v19, 1  ;;  %v1007_v55 = vrot.slane %v1003_v27, 1  ;;  %v826_v23 = vstv %s3300_s27  ;;  %s2295_s27 = sld [smem:[#allocation8 + $0x1e]] }
 0x117   : > { %v828_v45 = vmul.f32 %v826_v23, %v2876_v13 }
 0x118   : > { %v3793_v48 = vrot.slane %v3143_v29, 2 }
 0x11a   : > { %v3172_v61 = vsel %vm387_vm1, %v1718_v52, %v3793_v48 }
 0x11b   : > { %928 = vrot.lane.b32.xlu2 %v927_v56, %s2584_s11  ;;  %930 = vrot.lane.b32.xlu0 %v926_v42, %s2584_s11  ;;  %v1701_v42 = vrot.slane %v1697_v31, 2 }
 0x11d   : > { %v3166_v56 = vsel %vm387_vm1, %v1701_v42, %v3795_v43  ;;  %v1683_v42 = vstv %s3160_s13  ;;  %s3348_s13 = sld [smem:[#allocation8 + $0x34]] }
 0x11e   : > { %881 = vrot.lane.b32.xlu1 %v880_v24, %s2584_s11  ;;  %v976_v24 = vmul.f32 %v974_v26, %v3130_v17  ;;  %v1002_v26 = vmul.f32 %v1001_v10, %v3104_v32  ;;  %v3206_v53 = vmul.f32 %v1683_v42, %v2876_v13  ;;  %v1050_v10 = vmul.f32 %v1048_v5, %v3130_v17 }
 0x120   : > { %v3789_v19 = vrot.slane %v3206_v53, 2  ;;  %v1054_v27 = vrot.slane %v1050_v10, 2 }
 0x123   : > { %947 = vrot.lane.b32.xlu2 %v943_v36, %s2583_s9  ;;  %965 = vrot.lane.b32.xlu0 %v961_v60, %s2584_s11  ;;  %v3180_v36 = vsel %vm339_vm0, %v1253_v58, %v3792_v39  ;;  %v1636_v60 = vstv %s3139_s10  ;;  %v1006_v58 = vrot.slane %v1002_v26, 1  ;;  %v1053_v26 = vrot.slane %v1049_v1, 2  ;;  %s2315_s10 = sld [smem:[#allocation8 + $0x32]] }
 0x124   : > { %v1637_v31 = vmul.f32 %v1636_v60, %v2864_v7  ;;  %v3198_v37 = vmul.f32 %v1636_v60, %v2876_v13  ;;  %v700_v1 = vstv %s3228_s15  ;;  %s2286_s15 = sld [smem:[#allocation8 + $0x15]] }
 0x126   : > { %945 = vrot.lane.b32.xlu1 %v944_v35, %s2583_s9  ;;  %v962_v35 = vmul.f32 %v960_v9, %v3130_v17  ;;  %v1641_v44 = vrot.slane %v1637_v31, 1  ;;  %v3790_v52 = vrot.slane %v3198_v37, 1  ;;  %v1684_v9 = vmul.f32 %v1683_v42, %v2864_v7 }
 0x127   : > { %v1055_v31 = vsel %vm387_vm1, %v1053_v26, %v1054_v27  ;;  %v1106_v26 = vstv %s2294_s17  ;;  %s3377_s17 = sld [smem:[#allocation8 + $0x37]] }
 0x128   : > { %v1688_v12 = vrot.slane %v1684_v9, 2 }
 0x129   : > { %v1406_v2 = vstv %s2315_s10  ;;  %s3486_s10 = sld [smem:[#allocation8 + $0x24]] }
 0x12a   : > { %v3222_v60 = vsel %vm387_vm1, %v1688_v12, %v3789_v19  ;;  %v732_v19 = vstv %s3243_s26  ;;  %s3407_s26 = sld [smem:[#allocation8 + $0x3b]] }
 0x12b   : > { %979 = vrot.lane.b32.xlu2 %v975_v14, %s2583_s9  ;;  %981 = vrot.lane.b32.xlu0 %v976_v24, %s2583_s9  ;;  %v3212_v14 = vsel %vm339_vm0, %v1641_v44, %v3790_v52  ;;  %v1025_v24 = vsel %vm339_vm0, %v1023_v40, %v1024_v41  ;;  %v1065_v40 = vstv %s2291_s21  ;;  %v1092_v44 = vstv %s3226_s14  ;;  %s3367_s21 = sld [smem:[#allocation8 + $0x12]] }
 0x12c   : > { %v1066_v5 = vmul.f32 %v1065_v40, %v3104_v32  ;;  %v1067_v42 = vmul.f32 %v1065_v40, %v3130_v17  ;;  %v1107_v40 = vmul.f32 %v1106_v26, %v2819_v16  ;;  %s3373_s14 = sld [smem:[#allocation8 + $0x35]] }
 0x12d   : > { %v724_v10 = vpop.permute.xlu2 %723 }
 0x12e   : > { %967 = vrot.lane.b32.xlu1 %v962_v35, %s2584_s11  ;;  %v1008_v35 = vsel %vm339_vm0, %v1006_v58, %v1007_v55  ;;  %v1071_v9 = vrot.slane %v1067_v42, 2  ;;  %v1070_v58 = vrot.slane %v1066_v5, 2  ;;  %v1108_v5 = vmul.f32 %v1106_v26, %v2823_v21 }
 0x12f   : > { %v1150_v42 = vstv %s2297_s18  ;;  %s3385_s18 = sld [smem:[#allocation8 + $0x18]] }
 0x130   : > { %v1072_v12 = vsel %vm387_vm1, %v1070_v58, %v1071_v9 }
 0x133   : > { %1011 = vrot.lane.b32.xlu2 %v1007_v55, %s2584_s11  ;;  %1026 = vrot.lane.b32.xlu0 %v1025_v24, %s2583_s9  ;;  %v1093_v55 = vmul.f32 %v1092_v44, %v2819_v16  ;;  %v701_v24 = vmul.f32 %v700_v1, %v2819_v16 }
 0x136   : > { %1009 = vrot.lane.b32.xlu1 %v1008_v35, %s2584_s11 }
 0x13b   : > { %1056 = vrot.lane.b32.xlu2 %v1055_v31, %s2584_s11  ;;  %1058 = vrot.lane.b32.xlu0 %v1054_v27, %s2584_s11 }
 0x13e   : > { %1028 = vrot.lane.b32.xlu1 %v1024_v41, %s2583_s9 }
 0x143   : > { %1075 = vrot.lane.b32.xlu2 %v1071_v9, %s2583_s9  ;;  %1097 = vrot.lane.b32.xlu0 %v1093_v55, %s2584_s11  ;;  %v702_v9 = vmul.f32 %v700_v1, %v2823_v21  ;;  %v1152_v55 = vmul.f32 %v1150_v42, %v2823_v21 }
 0x145   : > { %v710_v35 = vpop.permute.xlu0 %709  ;;  %v1156_v52 = vrot.slane %v1152_v55, 1 }
 0x146   : > { %1073 = vrot.lane.b32.xlu1 %v1072_v12, %s2583_s9  ;;  %v715_v41 = vadd.f32 %v710_v35, %v701_v24  ;;  %v1094_v24 = vmul.f32 %v1092_v44, %v2823_v21  ;;  %v1151_v12 = vmul.f32 %v1150_v42, %v2819_v16 }
 0x148   : > { %v3246_v27 = vadd.f32 %v724_v10, %v715_v41  ;;  %v712_v31 = vpop.permute.xlu1 %711  ;;  %v1133_v10 = vstv %s2296_s25  ;;  %v1155_v44 = vrot.slane %v1151_v12, 1  ;;  %s3402_s25 = sld [smem:[#allocation8 + $0x38]] }
 0x149   : > { %v716_v58 = vadd.f32 %v712_v31, %v702_v9  ;;  %v1135_v26 = vmul.f32 %v1133_v10, %v2823_v21  ;;  %v1134_v31 = vmul.f32 %v1133_v10, %v2819_v16  ;;  %v1180_v9 = vstv %s2299_s28  ;;  %s3413_s28 = sld [smem:[#allocation8 + $0x3a]] }
 0x14a   : > { %v1157_v42 = vsel %vm339_vm0, %v1155_v44, %v1156_v52  ;;  %v1182_v39 = vmul.f32 %v1180_v9, %v2823_v21 }
 0x14b   : > { %1111 = vrot.lane.b32.xlu2 %v1107_v40, %s2583_s9  ;;  %1113 = vrot.lane.b32.xlu0 %v1108_v5, %s2583_s9  ;;  %v3264_v40 = vmul.f32 %v732_v19, %v2823_v21  ;;  %v1139_v5 = vrot.slane %v1135_v26, 1  ;;  %v1138_v55 = vrot.slane %v1134_v31, 1  ;;  %v1197_v31 = vstv %s2300_s29  ;;  %s2327_s29 = sld [smem:[#allocation8 + $0x3d]] }
 0x14c   : > { %v1186_v26 = vrot.slane %v1182_v39, 2 }
 0x14d   : > { %v3256_v35 = vpop.permute.xlu2 %851  ;;  %v726_v41 = vpop.permute.xlu0 %725  ;;  %v738_v3 = vrot.slane %v3264_v40, 1  ;;  %v1140_v10 = vsel %vm339_vm0, %v1138_v55, %v1139_v5 }
 0x14e   : > { %1099 = vrot.lane.b32.xlu1 %v1094_v24, %s2584_s11  ;;  %v730_v1 = vadd.f32 %v726_v41, %v716_v58  ;;  %v1181_v24 = vmul.f32 %v1180_v9, %v2819_v16  ;;  %v1199_v9 = vmul.f32 %v1197_v31, %v2823_v21 }
 0x150   : > { %v743_v58 = vadd.f32 %v738_v3, %v730_v1  ;;  %v1185_v44 = vrot.slane %v1181_v24, 2  ;;  %v1203_v55 = vrot.slane %v1199_v9, 2 }
 0x152   : > { %v1187_v48 = vsel %vm387_vm1, %v1185_v44, %v1186_v26 }
 0x153   : > { %1143 = vrot.lane.b32.xlu2 %v1139_v5, %s2584_s11  ;;  %1158 = vrot.lane.b32.xlu0 %v1157_v42, %s2583_s9  ;;  %v1220_v5 = vstv %s2302_s30  ;;  %v1198_v42 = vmul.f32 %v1197_v31, %v2819_v16  ;;  %s3442_s30 = sld [smem:[#allocation8 + $0x1b]] }
 0x154   : > { %v1221_v39 = vmul.f32 %v1220_v5, %v2864_v7  ;;  %v1222_v31 = vmul.f32 %v1220_v5, %v2876_v13 }
 0x155   : > { %v756_v12 = vpop.permute.xlu2 %755 }
 0x156   : > { %1141 = vrot.lane.b32.xlu1 %v1140_v10, %s2584_s11  ;;  %v760_v41 = vadd.f32 %v756_v12, %v743_v58 }
 0x15b   : > { %1188 = vrot.lane.b32.xlu2 %v1187_v48, %s2584_s11  ;;  %1190 = vrot.lane.b32.xlu0 %v1186_v26, %s2584_s11  ;;  %v1202_v48 = vrot.slane %v1198_v42, 2 }
 0x15d   : > { %v820_v1 = vpop.permute.xlu2 %819  ;;  %v1204_v58 = vsel %vm387_vm1, %v1202_v48, %v1203_v55 }
 0x15e   : > { %1160 = vrot.lane.b32.xlu1 %v1156_v52, %s2583_s9  ;;  %v1234_v52 = vstv %s2303_s6  ;;  %s2328_s6 = sld [smem:[#allocation8 + $0x3e]] }
 0x15f   : > { %v1235_v26 = vmul.f32 %v1234_v52, %v2864_v7  ;;  %v1236_v44 = vmul.f32 %v1234_v52, %v2876_v13 }
 0x163   : > { %1207 = vrot.lane.b32.xlu2 %v1203_v55, %s2583_s9  ;;  %1225 = vrot.lane.b32.xlu0 %v1221_v39, %s2584_s11  ;;  %v779_v55 = vstv %s3289_s23  ;;  %s3451_s23 = sld [smem:[#allocation8 + $0x40]] }
 0x164   : > { %v781_v39 = vmul.f32 %v779_v55, %v2823_v21 }
 0x165   : > { %v884_v24 = vpop.permute.xlu2 %883  ;;  %v3287_v10 = vpop.permute.xlu0 %837 }
 0x166   : > { %1205 = vrot.lane.b32.xlu1 %v1204_v58, %s2583_s9  ;;  %v785_v52 = vrot.slane %v781_v39, 2 }
 0x168   : > { %v840_v12 = vpop.permute.xlu1 %839 }
 0x16b   : > { %1239 = vrot.lane.b32.xlu2 %v1235_v26, %s2583_s9  ;;  %1241 = vrot.lane.b32.xlu0 %v1236_v44, %s2583_s9 }
 0x16d   : > { %v801_v9 = vpop.permute.xlu2 %800  ;;  %v854_v42 = vpop.permute.xlu0 %853 }
 0x16e   : > { %1227 = vrot.lane.b32.xlu1 %v1222_v31, %s2584_s11 }
 0x170   : > { %v773_v48 = vpop.permute.xlu1 %772 }
 0x171   : > { %v777_v58 = vadd.f32 %v773_v48, %v760_v41  ;;  %v733_v41 = vmul.f32 %v732_v19, %v2819_v16 }
 0x173   : > { %1271 = vrot.lane.b32.xlu2 %v1267_v54, %s2584_s11  ;;  %1286 = vrot.lane.b32.xlu0 %v2973_v4, %s2583_s9  ;;  %v790_v5 = vadd.f32 %v785_v52, %v777_v58 }
 0x175   : > { %v3307_v26 = vpop.permute.xlu2 %928  ;;  %v803_v44 = vpop.permute.xlu0 %802 }
 0x176   : > { %1269 = vrot.lane.b32.xlu1 %v2961_v62, %s2584_s11  ;;  %v807_v31 = vadd.f32 %v803_v44, %v790_v5  ;;  %v737_v62 = vrot.slane %v733_v41, 1  ;;  %v780_v44 = vmul.f32 %v779_v55, %v2819_v16  ;;  %v827_v41 = vmul.f32 %v826_v23, %v2864_v7 }
 0x178   : > { %v824_v54 = vadd.f32 %v820_v1, %v807_v31  ;;  %v901_v39 = vpop.permute.xlu1 %900  ;;  %v739_v19 = vsel %vm339_vm0, %v737_v62, %v738_v3  ;;  %v784_v55 = vrot.slane %v780_v44, 2 }
 0x179   : > { %v742_v59 = vadd.f32 %v739_v19, %v3246_v27  ;;  %v1362_v27 = vstv %s2312_s8  ;;  %s2298_s8 = sld [smem:[#allocation8 + $0x21]] }
 0x17a   : > { %v830_v4 = vadd.f32 %v828_v45, %v824_v54  ;;  %v786_v63 = vsel %vm387_vm1, %v784_v55, %v785_v52  ;;  %v1363_v52 = vmul.f32 %v1362_v27, %v3104_v32  ;;  %v1364_v54 = vmul.f32 %v1362_v27, %v3130_v17 }
 0x17b   : > { %1316 = vrot.lane.b32.xlu2 %v2983_v20, %s2584_s11  ;;  %1318 = vrot.lane.b32.xlu0 %v1314_v8, %s2584_s11  ;;  %v1348_v20 = vstv %s3311_s7  ;;  %s2331_s7 = sld [smem:[#allocation8 + $0x41]] }
 0x17c   : > { %v844_v48 = vadd.f32 %v840_v12, %v830_v4  ;;  %v1407_v4 = vmul.f32 %v1406_v2, %v3104_v32 }
 0x17d   : > { %v948_v58 = vpop.permute.xlu2 %947  ;;  %v771_v5 = vpop.permute.xlu0 %770 }
 0x17e   : > { %v858_v43 = vadd.f32 %v854_v42, %v844_v48  ;;  %1288 = vrot.lane.b32.xlu1 %v1284_v57, %s2583_s9  ;;  %v1349_v42 = vmul.f32 %v1348_v20, %v3104_v32  ;;  %v1411_v19 = vrot.slane %v1407_v4, 1  ;;  %v1480_v4 = vstv %s3377_s17  ;;  %s3550_s17 = sld [smem:[#allocation8 + $0x2d]] }
 0x180   : > { %v871_v8 = vadd.f32 %v866_v33, %v858_v43  ;;  %v754_v1 = vpop.permute.xlu1 %753 }
 0x181   : > { %v759_v12 = vadd.f32 %v754_v1, %v742_v59  ;;  %v1436_v1 = vstv %s3348_s13  ;;  %s2340_s13 = sld [smem:[#allocation8 + $0x4a]] }
 0x182   : > { %v888_v31 = vadd.f32 %v884_v24, %v871_v8 }
 0x183   : > { %v776_v49 = vadd.f32 %v771_v5, %v759_v12  ;;  %1335 = vrot.lane.b32.xlu2 %v1331_v11, %s2583_s9  ;;  %1353 = vrot.lane.b32.xlu0 %v1349_v42, %s2584_s11 }
 0x184   : > { %v905_v57 = vadd.f32 %v901_v39, %v888_v31  ;;  %v1389_v39 = vstv %s3335_s12  ;;  %s3504_s12 = sld [smem:[#allocation8 + $0x49]] }
 0x185   : > { %v3342_v33 = vpop.permute.xlu2 %979  ;;  %v899_v43 = vpop.permute.xlu0 %898  ;;  %v789_v3 = vadd.f32 %v786_v63, %v776_v49  ;;  %v1390_v48 = vmul.f32 %v1389_v39, %v3104_v32  ;;  %v1391_v5 = vmul.f32 %v1389_v39, %v3130_v17  ;;  %v1437_v49 = vmul.f32 %v1436_v1, %v3104_v32 }
 0x186   : > { %1333 = vrot.lane.b32.xlu1 %v3006_v0, %s2583_s9  ;;  %v918_v40 = vadd.f32 %v913_v15, %v905_v57  ;;  %v1408_v0 = vmul.f32 %v1406_v2, %v3130_v17  ;;  %v1350_v15 = vmul.f32 %v1348_v20, %v3130_v17  ;;  %v1438_v57 = vmul.f32 %v1436_v1, %v3130_v17 }
 0x187   : > { %v806_v24 = vadd.f32 %v801_v9, %v789_v3  ;;  %v1395_v20 = vrot.slane %v1391_v5, 1  ;;  %v1394_v55 = vrot.slane %v1390_v48, 1  ;;  %v1441_v27 = vrot.slane %v1437_v49, 2 }
 0x188   : > { %v818_v11 = vpop.permute.xlu1 %817  ;;  %v1412_v59 = vrot.slane %v1408_v0, 1  ;;  %v954_v2 = vstv %s3367_s21  ;;  %v988_v39 = vstv %s2286_s15  ;;  %v1035_v1 = vstv %s3385_s18  ;;  %s2343_s21 = sld [smem:[#allocation8 + $0x4d]] }
 0x189   : > { %v823_v45 = vadd.f32 %v818_v11, %v806_v24  ;;  %v990_v48 = vmul.f32 %v988_v39, %v3130_v17  ;;  %s3531_s15 = sld [smem:[#allocation8 + $0x4f]] }
 0x18a   : > { %v1413_v31 = vsel %vm339_vm0, %v1411_v19, %v1412_v59  ;;  %s2346_s18 = sld [smem:[#allocation8 + $0x50]] }
 0x18b   : > { %v829_v25 = vadd.f32 %v827_v41, %v823_v45  ;;  %1367 = vrot.lane.b32.xlu2 %v1363_v52, %s2583_s9  ;;  %1369 = vrot.lane.b32.xlu0 %v1364_v54, %s2583_s9  ;;  %v1453_v45 = vstv %s3373_s14  ;;  %v955_v52 = vmul.f32 %v954_v2, %v3104_v32  ;;  %s2342_s14 = sld [smem:[#allocation8 + $0x4c]] }
 0x18d   : > { %v843_v23 = vadd.f32 %v3287_v10, %v829_v25  ;;  %v3360_v9 = vpop.permute.xlu2 %1011  ;;  %v931_v62 = vpop.permute.xlu0 %930 }
 0x18e   : > { %1355 = vrot.lane.b32.xlu1 %v1350_v15, %s2584_s11  ;;  %v935_v44 = vadd.f32 %v931_v62, %v918_v40  ;;  %v1442_v40 = vrot.slane %v1438_v57, 2  ;;  %v956_v15 = vmul.f32 %v954_v2, %v3130_v17  ;;  %v989_v62 = vmul.f32 %v988_v39, %v3104_v32 }
 0x18f   : > { %v857_v8 = vadd.f32 %v3256_v35, %v843_v23  ;;  %v1396_v35 = vsel %vm339_vm0, %v1394_v55, %v1395_v20  ;;  %v1455_v23 = vmul.f32 %v1453_v45, %v3130_v17  ;;  %v1037_v57 = vmul.f32 %v1035_v1, %v3130_v17 }
 0x190   : > { %v952_v12 = vadd.f32 %v948_v58, %v935_v44  ;;  %v882_v42 = vpop.permute.xlu1 %881 }
 0x191   : > { %v870_v10 = vadd.f32 %v3016_v50, %v857_v8  ;;  %v1481_v8 = vmul.f32 %v1480_v4, %v2819_v16 }
 0x192   : > { %v958_v44 = vadd.f32 %v956_v15, %v952_v12  ;;  %v1036_v12 = vmul.f32 %v1035_v1, %v3104_v32 }
 0x193   : > { %v887_v63 = vadd.f32 %v882_v42, %v870_v10  ;;  %1399 = vrot.lane.b32.xlu2 %v1395_v20, %s2584_s11  ;;  %1414 = vrot.lane.b32.xlu0 %v1413_v31, %s2583_s9  ;;  %v1459_v10 = vrot.slane %v1455_v23, 2  ;;  %v994_v31 = vrot.slane %v990_v48, 1 }
 0x195   : > { %v904_v50 = vadd.f32 %v899_v43, %v887_v63  ;;  %v3380_v58 = vpop.permute.xlu2 %1056  ;;  %v966_v3 = vpop.permute.xlu0 %965  ;;  %v1443_v43 = vsel %vm387_vm1, %v1441_v27, %v1442_v40  ;;  %v1494_v27 = vstv %s3402_s25  ;;  %s3557_s25 = sld [smem:[#allocation10]] }
 0x196   : > { %1397 = vrot.lane.b32.xlu1 %v1396_v35, %s2584_s11 }
 0x197   : > { %v917_v24 = vadd.f32 %v3021_v51, %v904_v50 }
 0x198   : > { %v946_v11 = vpop.permute.xlu1 %945 }
 0x199   : > { %v934_v41 = vadd.f32 %v3307_v26, %v917_v24  ;;  %v1454_v26 = vmul.f32 %v1453_v45, %v3104_v32  ;;  %v1495_v45 = vmul.f32 %v1494_v27, %v2819_v16 }
 0x19b   : > { %v951_v54 = vadd.f32 %v946_v11, %v934_v41  ;;  %1444 = vrot.lane.b32.xlu2 %v1443_v43, %s2584_s11  ;;  %1446 = vrot.lane.b32.xlu0 %v1442_v40, %s2584_s11  ;;  %v1458_v20 = vrot.slane %v1454_v26, 2  ;;  %v1040_v11 = vrot.slane %v1036_v12, 2  ;;  %v1041_v41 = vrot.slane %v1037_v57, 2 }
 0x19d   : > { %v957_v51 = vadd.f32 %v955_v52, %v951_v54  ;;  %v3394_v0 = vpop.permute.xlu2 %1075  ;;  %v982_v25 = vpop.permute.xlu0 %981  ;;  %v1460_v63 = vsel %vm387_vm1, %v1458_v20, %v1459_v10  ;;  %v1496_v52 = vmul.f32 %v1494_v27, %v2823_v21  ;;  %v1538_v54 = vstv %s3407_s26  ;;  %s2313_s26 = sld [smem:[#allocation8 + $0x30]] }
 0x19e   : > { %1416 = vrot.lane.b32.xlu1 %v1412_v59, %s2583_s9  ;;  %v993_v59 = vrot.slane %v989_v62, 1  ;;  %v1540_v39 = vmul.f32 %v1538_v54, %v2823_v21  ;;  %v1539_v15 = vmul.f32 %v1538_v54, %v2819_v16  ;;  %v1042_v26 = vsel %vm387_vm1, %v1040_v11, %v1041_v41 }
 0x19f   : > { %v971_v5 = vadd.f32 %v966_v3, %v957_v51  ;;  %v1568_v20 = vstv %s2327_s29  ;;  %v1585_v11 = vstv %s2328_s6  ;;  %s2319_s29 = sld [smem:[#allocation10 + $0x1]] }
 0x1a0   : > { %v968_v19 = vpop.permute.xlu1 %967  ;;  %v995_v3 = vsel %vm339_vm0, %v993_v59, %v994_v31  ;;  %v1570_v59 = vmul.f32 %v1568_v20, %v2823_v21  ;;  %v1569_v12 = vmul.f32 %v1568_v20, %v2819_v16  ;;  %s2323_s6 = sld [smem:[#allocation8 + $0x39]] }
 0x1a1   : > { %v972_v42 = vadd.f32 %v968_v19, %v958_v44  ;;  %v985_v55 = vadd.f32 %v3342_v33, %v971_v5  ;;  %v1544_v44 = vrot.slane %v1540_v39, 1  ;;  %v1586_v39 = vmul.f32 %v1585_v11, %v2819_v16 }
 0x1a2   : > { %v1573_v27 = vrot.slane %v1569_v12, 2 }
 0x1a3   : > { %v986_v49 = vadd.f32 %v982_v25, %v972_v42  ;;  %1463 = vrot.lane.b32.xlu2 %v1459_v10, %s2583_s9  ;;  %1485 = vrot.lane.b32.xlu0 %v1481_v8, %s2584_s11  ;;  %v998_v40 = vadd.f32 %v995_v3, %v985_v55  ;;  %v1482_v25 = vmul.f32 %v1480_v4, %v2823_v21  ;;  %v1543_v4 = vrot.slane %v1539_v15, 1 }
 0x1a5   : > { %v3416_v33 = vpop.permute.xlu2 %1111  ;;  %v1027_v50 = vpop.permute.xlu0 %1026  ;;  %v999_v35 = vadd.f32 %v994_v31, %v986_v49  ;;  %v1545_v55 = vsel %vm339_vm0, %v1543_v4, %v1544_v44 }
 0x1a6   : > { %1461 = vrot.lane.b32.xlu1 %v1460_v63, %s2583_s9 }
 0x1a7   : > { %v1016_v24 = vadd.f32 %v3360_v9, %v999_v35  ;;  %v1521_v9 = vstv %s3413_s28  ;;  %v1574_v35 = vrot.slane %v1570_v59, 2  ;;  %s2316_s28 = sld [smem:[#allocation8 + $0x33]] }
 0x1a8   : > { %v1010_v2 = vpop.permute.xlu1 %1009  ;;  %v1523_v48 = vmul.f32 %v1521_v9, %v2823_v21  ;;  %v1522_v19 = vmul.f32 %v1521_v9, %v2819_v16 }
 0x1a9   : > { %v1015_v43 = vadd.f32 %v1010_v2, %v998_v40  ;;  %v1088_v2 = vstv %s3442_s30  ;;  %s2320_s30 = sld [smem:[#allocation8 + $0x36]] }
 0x1aa   : > { %v1527_v10 = vrot.slane %v1523_v48, 1  ;;  %v1526_v49 = vrot.slane %v1522_v19, 1  ;;  %v1089_v54 = vmul.f32 %v1088_v2, %v2819_v16  ;;  %v1590_v19 = vrot.slane %v1586_v39, 2 }
 0x1ab   : > { %v1032_v51 = vadd.f32 %v1027_v50, %v1015_v43  ;;  %1499 = vrot.lane.b32.xlu2 %v1495_v45, %s2583_s9  ;;  %1501 = vrot.lane.b32.xlu0 %v1496_v52, %s2583_s9  ;;  %v1587_v45 = vmul.f32 %v1585_v11, %v2823_v21  ;;  %v1608_v52 = vstv %s3451_s23  ;;  %s2326_s23 = sld [smem:[#allocation8 + $0x3c]] }
 0x1ac   : > { %v1528_v57 = vsel %vm339_vm0, %v1526_v49, %v1527_v10  ;;  %v1609_v48 = vmul.f32 %v1608_v52, %v2864_v7 }
 0x1ad   : > { %v3432_v23 = vpop.permute.xlu2 %1143  ;;  %v1059_v62 = vpop.permute.xlu0 %1058  ;;  %v1045_v5 = vadd.f32 %v1042_v26, %v1032_v51  ;;  %v1120_v51 = vstv %s2295_s27  ;;  %v1090_v26 = vmul.f32 %v1088_v2, %v2823_v21  ;;  %s2329_s27 = sld [smem:[#allocation8 + $0x3f]] }
 0x1ae   : > { %1487 = vrot.lane.b32.xlu1 %v1482_v25, %s2584_s11  ;;  %v1122_v9 = vmul.f32 %v1120_v51, %v2823_v21 }
 0x1af   : > { %v1062_v8 = vadd.f32 %v3380_v58, %v1045_v5  ;;  %v1121_v5 = vmul.f32 %v1120_v51, %v2819_v16 }
 0x1b0   : > { %v1029_v1 = vpop.permute.xlu1 %1028 }
 0x1b1   : > { %v1033_v42 = vadd.f32 %v1029_v1, %v1016_v24  ;;  %v1575_v24 = vsel %vm387_vm1, %v1573_v27, %v1574_v35  ;;  %v1125_v20 = vrot.slane %v1121_v5, 1 }
 0x1b3   : > { %v1046_v31 = vadd.f32 %v1041_v41, %v1033_v42  ;;  %1531 = vrot.lane.b32.xlu2 %v1527_v10, %s2584_s11  ;;  %1546 = vrot.lane.b32.xlu0 %v1545_v55, %s2583_s9  ;;  %v1622_v55 = vstv %s2331_s7  ;;  %s2338_s7 = sld [smem:[#allocation8 + $0x48]] }
 0x1b5   : > { %v3445_v58 = vadd.f32 %v1059_v62, %v1046_v31  ;;  %v3448_v63 = vpop.permute.xlu2 %1188  ;;  %v1098_v50 = vpop.permute.xlu0 %1097  ;;  %v1591_v62 = vrot.slane %v1587_v45, 2 }
 0x1b6   : > { %1529 = vrot.lane.b32.xlu1 %v1528_v57, %s2584_s11  ;;  %v1103_v15 = vadd.f32 %v1098_v50, %v1089_v54  ;;  %v1623_v57 = vmul.f32 %v1622_v55, %v2864_v7  ;;  %v1624_v50 = vmul.f32 %v1622_v55, %v2876_v13 }
 0x1b7   : > { %v1592_v4 = vsel %vm387_vm1, %v1590_v19, %v1591_v62  ;;  %v3491_v51 = vadd.f32 %v3394_v0, %v3445_v58  ;;  %v1214_v0 = vstv %s3486_s10  ;;  %v3799_v19 = vrot.slane %v3136_v34, 2  ;;  %s2344_s10 = sld [smem:[#allocation8 + $0x4e]] }
 0x1b8   : > { %v1074_v3 = vpop.permute.xlu1 %1073  ;;  %v1117_v1 = vadd.f32 %v3416_v33, %v1103_v15 }
 0x1b9   : > { %v3453_v40 = vadd.f32 %v1074_v3, %v1062_v8  ;;  %v1126_v8 = vrot.slane %v1122_v9, 1 }
 0x1bb   : > { %1576 = vrot.lane.b32.xlu2 %v1575_v24, %s2584_s11  ;;  %1578 = vrot.lane.b32.xlu0 %v1574_v35, %s2584_s11  ;;  %v1127_v31 = vsel %vm339_vm0, %v1125_v20, %v1126_v8  ;;  %v1167_v35 = vstv %s2298_s8  ;;  %v1610_v24 = vmul.f32 %v1608_v52, %v2876_v13  ;;  %v1216_v20 = vmul.f32 %v1214_v0, %v2876_v13  ;;  %s2341_s8 = sld [smem:[#allocation8 + $0x4b]] }
 0x1bc   : > { %v1130_v12 = vadd.f32 %v1127_v31, %v1117_v1  ;;  %v1169_v33 = vmul.f32 %v1167_v35, %v2823_v21  ;;  %v1168_v2 = vmul.f32 %v1167_v35, %v2819_v16 }
 0x1bd   : > { %v3459_v41 = vpop.permute.xlu2 %1207  ;;  %v1114_v43 = vpop.permute.xlu0 %1113 }
 0x1be   : > { %1548 = vrot.lane.b32.xlu1 %v1544_v44, %s2583_s9  ;;  %v1173_v45 = vrot.slane %v1169_v33, 2 }
 0x1c0   : > { %v1100_v25 = vpop.permute.xlu1 %1099 }
 0x1c1   : > { %v1104_v44 = vadd.f32 %v1100_v25, %v1090_v26  ;;  %v1172_v25 = vrot.slane %v1168_v2, 2 }
 0x1c3   : > { %1595 = vrot.lane.b32.xlu2 %v1591_v62, %s2583_s9  ;;  %1613 = vrot.lane.b32.xlu0 %v1609_v48, %s2584_s11  ;;  %v1118_v59 = vadd.f32 %v1114_v43, %v1104_v44  ;;  %v1174_v15 = vsel %vm387_vm1, %v1172_v25, %v1173_v45 }
 0x1c5   : > { %v1240_v42 = vpop.permute.xlu2 %1239  ;;  %v1159_v10 = vpop.permute.xlu0 %1158  ;;  %v1131_v27 = vadd.f32 %v1126_v8, %v1118_v59 }
 0x1c6   : > { %1593 = vrot.lane.b32.xlu1 %v1592_v4, %s2583_s9 }
 0x1c7   : > { %v1148_v39 = vadd.f32 %v3432_v23, %v1131_v27 }
 0x1c8   : > { %v1142_v49 = vpop.permute.xlu1 %1141 }
 0x1c9   : > { %v1147_v3 = vadd.f32 %v1142_v49, %v1130_v12 }
 0x1cb   : > { %1627 = vrot.lane.b32.xlu2 %v1623_v57, %s2583_s9  ;;  %1629 = vrot.lane.b32.xlu0 %v1624_v50, %s2583_s9  ;;  %v1164_v54 = vadd.f32 %v1159_v10, %v1147_v3  ;;  %v1736_v10 = vstv %s3504_s12  ;;  %v1794_v50 = vstv %s2343_s21  ;;  %s2347_s12 = sld [smem:[#allocation10 + $0x2]]  ;;  %s2586_s21 = smov 124  }
 0x1cc   : > { %v1737_v34 = vmul.f32 %v1736_v10, %v3104_v32  ;;  %v1777_v3 = vstv %s2342_s14  ;;  %v1795_v27 = vmul.f32 %v1794_v50, %v3104_v32  ;;  %s2587_s14 = smov 123  }
 0x1cd   : > { %v3483_v11 = vpop.permute.xlu2 %1271  ;;  %v1191_v43 = vpop.permute.xlu0 %1190  ;;  %v1177_v26 = vadd.f32 %v1174_v15, %v1164_v54  ;;  %v1778_v25 = vmul.f32 %v1777_v3, %v3104_v32 }
 0x1ce   : > { %1615 = vrot.lane.b32.xlu1 %v1610_v24, %s2584_s11  ;;  %v1796_v24 = vmul.f32 %v1794_v50, %v3130_v17  ;;  %v1799_v15 = vrot.slane %v1795_v27, 1  ;;  %v1376_v50 = vstv %s2313_s26 }
 0x1cf   : > { %v1194_v58 = vadd.f32 %v3448_v63, %v1177_v26  ;;  %v3800_v63 = vrot.slane %v3096_v6, 1  ;;  %v1378_v27 = vmul.f32 %v1376_v50, %v3130_v17 }
 0x1d0   : > { %v1161_v52 = vpop.permute.xlu1 %1160  ;;  %v1800_v26 = vrot.slane %v1796_v24, 1 }
 0x1d1   : > { %v1165_v9 = vadd.f32 %v1161_v52, %v1148_v39  ;;  %v1779_v52 = vmul.f32 %v1777_v3, %v3130_v17  ;;  %v1377_v3 = vmul.f32 %v1376_v50, %v3104_v32 }
 0x1d3   : > { %1659 = vrot.lane.b32.xlu2 %v1655_v22, %s2584_s11  ;;  %1674 = vrot.lane.b32.xlu0 %v3123_v18, %s2583_s9  ;;  %v1178_v62 = vadd.f32 %v1173_v45, %v1165_v9  ;;  %v1215_v22 = vmul.f32 %v1214_v0, %v2864_v7  ;;  %v1738_v45 = vmul.f32 %v1736_v10, %v3130_v17  ;;  %v1342_v10 = vstv %s3550_s17 }
 0x1d5   : > { %v3499_v48 = vpop.permute.xlu2 %1316  ;;  %v1226_v23 = vpop.permute.xlu0 %1225  ;;  %v1195_v28 = vadd.f32 %v1191_v43, %v1178_v62 }
 0x1d6   : > { %1657 = vrot.lane.b32.xlu1 %v3117_v46, %s2584_s11 }
 0x1d7   : > { %v1212_v4 = vadd.f32 %v3459_v41, %v1195_v28  ;;  %v3801_v41 = vrot.slane %v3143_v29, 2  ;;  %v1801_v28 = vsel %vm339_vm0, %v1799_v15, %v1800_v26  ;;  %v1423_v15 = vstv %s2316_s28 }
 0x1d8   : > { %v1206_v5 = vpop.permute.xlu1 %1205 }
 0x1d9   : > { %v1211_v44 = vadd.f32 %v1206_v5, %v1194_v58  ;;  %v1218_v59 = vadd.f32 %v1216_v20, %v1212_v4  ;;  %v1783_v58 = vrot.slane %v1779_v52, 1  ;;  %v1782_v5 = vrot.slane %v1778_v25, 1 }
 0x1db   : > { %v1217_v18 = vadd.f32 %v1215_v22, %v1211_v44  ;;  %1704 = vrot.lane.b32.xlu2 %v3166_v56, %s2584_s11  ;;  %1706 = vrot.lane.b32.xlu0 %v3799_v19, %s2584_s11 }
 0x1dd   : > { %v1231_v46 = vadd.f32 %v1226_v23, %v1217_v18  ;;  %v3513_v8 = vpop.permute.xlu2 %1335  ;;  %v1242_v1 = vpop.permute.xlu0 %1241  ;;  %v1824_v23 = vstv %s3531_s15  ;;  %v1784_v18 = vsel %vm339_vm0, %v1782_v5, %v1783_v58  ;;  %v1425_v5 = vmul.f32 %v1423_v15, %v3130_v17 }
 0x1de   : > { %1676 = vrot.lane.b32.xlu1 %v3800_v63, %s2583_s9  ;;  %v1825_v22 = vmul.f32 %v1824_v23, %v3104_v32 }
 0x1df   : > { %v1245_v55 = vadd.f32 %v1240_v42, %v1231_v46  ;;  %v1750_v42 = vstv %s2340_s13  ;;  %s2585_s13 = smov 125  }
 0x1e0   : > { %v1228_v56 = vpop.permute.xlu1 %1227  ;;  %v1751_v33 = vmul.f32 %v1750_v42, %v3104_v32  ;;  %v1752_v29 = vmul.f32 %v1750_v42, %v3130_v17 }
 0x1e1   : > { %v1258_v31 = vadd.f32 %v3180_v36, %v1245_v55  ;;  %v1232_v49 = vadd.f32 %v1228_v56, %v1218_v59  ;;  %v1841_v59 = vstv %s2346_s18 }
 0x1e3   : > { %1723 = vrot.lane.b32.xlu2 %v3801_v41, %s2583_s9  ;;  %1741 = vrot.lane.b32.xlu0 %v1737_v34, %s2584_s11  ;;  %v1246_v57 = vadd.f32 %v1242_v1, %v1232_v49  ;;  %v1829_v1 = vrot.slane %v1825_v22, 2  ;;  %v1343_v34 = vmul.f32 %v1342_v10, %v3104_v32  ;;  %v1842_v49 = vmul.f32 %v1841_v59, %v3104_v32 }
 0x1e4   : > { %v1843_v41 = vmul.f32 %v1841_v59, %v3130_v17  ;;  %v1470_v59 = vstv %s2319_s29 }
 0x1e5   : > { %v3527_v6 = vpop.permute.xlu2 %1367  ;;  %v1287_v12 = vpop.permute.xlu0 %1286 }
 0x1e6   : > { %1721 = vrot.lane.b32.xlu1 %v3172_v61, %s2583_s9  ;;  %v3802_v61 = vrot.slane %v3152_v47, 1 }
 0x1e8   : > { %v1270_v36 = vpop.permute.xlu1 %1269  ;;  %v1259_v43 = vadd.f32 %v3802_v61, %v1246_v57  ;;  %v1847_v61 = vrot.slane %v1843_v41, 2 }
 0x1e9   : > { %v1275_v35 = vadd.f32 %v1270_v36, %v1258_v31  ;;  %v1082_v31 = vstv %s3557_s25 }
 0x1ea   : > { %v1276_v62 = vadd.f32 %v3483_v11, %v1259_v43  ;;  %v3803_v11 = vrot.slane %v3158_v38, 2 }
 0x1eb   : > { %v1292_v2 = vadd.f32 %v1287_v12, %v1275_v35  ;;  %1755 = vrot.lane.b32.xlu2 %v1751_v33, %s2583_s9  ;;  %1757 = vrot.lane.b32.xlu0 %v1752_v29, %s2583_s9  ;;  %v1344_v35 = vmul.f32 %v1342_v10, %v3130_v17  ;;  %v1846_v29 = vrot.slane %v1842_v49, 2 }
 0x1ed   : > { %v3542_v54 = vpop.permute.xlu2 %1399  ;;  %v1319_v39 = vpop.permute.xlu0 %1318  ;;  %v1305_v9 = vadd.f32 %v3188_v30, %v1292_v2  ;;  %v1826_v30 = vmul.f32 %v1824_v23, %v3130_v17 }
 0x1ee   : > { %1743 = vrot.lane.b32.xlu1 %v1738_v45, %s2584_s11  ;;  %v1382_v45 = vrot.slane %v1378_v27, 1 }
 0x1ef   : > { %v1830_v4 = vrot.slane %v1826_v30, 2  ;;  %v1322_v63 = vadd.f32 %v3499_v48, %v1305_v9  ;;  %v3575_v48 = vadd.f32 %v1082_v31, %v3453_v40 }
 0x1f0   : > { %v1289_v47 = vpop.permute.xlu1 %1288 }
 0x1f1   : > { %v1293_v0 = vadd.f32 %v1289_v47, %v1276_v62  ;;  %v1831_v38 = vsel %vm387_vm1, %v1829_v1, %v1830_v4  ;;  %v1085_v40 = vmax.f32 %v3575_v48, 0.0  ;;  %v3592_v47 = vadd.f32 %v1082_v31, %v3491_v51 }
 0x1f3   : > { %1787 = vrot.lane.b32.xlu2 %v1783_v58, %s2584_s11  ;;  %1802 = vrot.lane.b32.xlu0 %v1801_v28, %s2583_s9  ;;  %v1306_v44 = vadd.f32 %v3803_v11, %v1293_v0  ;;  %v1424_v58 = vmul.f32 %v1423_v15, %v3104_v32 }
 0x1f5   : > { %v3562_v19 = vpop.permute.xlu2 %1444  ;;  %v1354_v46 = vpop.permute.xlu0 %1353  ;;  %v1323_v55 = vadd.f32 %v1319_v39, %v1306_v44  ;;  %v1848_v39 = vsel %vm387_vm1, %v1846_v29, %v1847_v61  ;;  %v1428_v11 = vrot.slane %v1424_v58, 2  ;;  %v1429_v44 = vrot.slane %v1425_v5, 2 }
 0x1f6   : > { %1785 = vrot.lane.b32.xlu1 %v1784_v18, %s2584_s11 }
 0x1f7   : > { %v1340_v57 = vadd.f32 %v3513_v8, %v1323_v55  ;;  %v1381_v8 = vrot.slane %v1377_v3, 1 }
 0x1f8   : > { %v1334_v20 = vpop.permute.xlu1 %1333 }
 0x1f9   : > { %v1339_v56 = vadd.f32 %v1334_v20, %v1322_v63  ;;  %v1346_v2 = vadd.f32 %v1344_v35, %v1340_v57  ;;  %v1383_v62 = vsel %vm339_vm0, %v1381_v8, %v1382_v45  ;;  %v1430_v63 = vsel %vm387_vm1, %v1428_v11, %v1429_v44 }
 0x1fa   : > { %v1476_v57 = vstv %s2320_s30 }
 0x1fb   : > { %1832 = vrot.lane.b32.xlu2 %v1831_v38, %s2584_s11  ;;  %1834 = vrot.lane.b32.xlu0 %v1830_v4, %s2584_s11  ;;  %v1345_v12 = vadd.f32 %v1343_v34, %v1339_v56  ;;  %v1478_v27 = vmul.f32 %v1476_v57, %v2823_v21 }
 0x1fd   : > { %v1370_v42 = vpop.permute.xlu0 %1369  ;;  %v1464_v36 = vpop.permute.xlu2 %1463  ;;  %v1359_v24 = vadd.f32 %v1354_v46, %v1345_v12 }
 0x1fe   : > { %1804 = vrot.lane.b32.xlu1 %v1800_v26, %s2583_s9 }
 0x1ff   : > { %v1373_v52 = vadd.f32 %v3527_v6, %v1359_v24  ;;  %v1086_v6 = vmax.f32 %v3592_v47, 0.0 }
 0x200   : > { %v1356_v33 = vpop.permute.xlu1 %1355 }
 0x201   : > { %v1360_v43 = vadd.f32 %v1356_v33, %v1346_v2  ;;  %v1386_v0 = vadd.f32 %v1383_v62, %v1373_v52  ;;  %v1555_v62 = vstv %s2326_s23 }
 0x202   : > { %v1556_v5 = vmul.f32 %v1555_v62, %v2819_v16 }
 0x203   : > { %1851 = vrot.lane.b32.xlu2 %v1847_v61, %s2583_s9  ;;  %1869 = vrot.lane.b32.xlu0 %v1085_v40, %s2584_s11  ;;  %v1374_v9 = vadd.f32 %v1370_v42, %v1360_v43 }
 0x205   : > { %v1415_v25 = vpop.permute.xlu0 %1414  ;;  %v1500_v26 = vpop.permute.xlu2 %1499  ;;  %v1387_v22 = vadd.f32 %v1382_v45, %v1374_v9 }
 0x206   : > { %1849 = vrot.lane.b32.xlu1 %v1848_v39, %s2583_s9 }
 0x207   : > { %v1404_v51 = vadd.f32 %v3542_v54, %v1387_v22 }
 0x208   : > { %v1398_v23 = vpop.permute.xlu1 %1397 }
 0x209   : > { %v1403_v28 = vadd.f32 %v1398_v23, %v1386_v0  ;;  %v1557_v23 = vmul.f32 %v1555_v62, %v2823_v21 }
 0x20b   : > { %v1420_v18 = vadd.f32 %v1415_v25, %v1403_v28  ;;  %v1561_v22 = vrot.slane %v1557_v23, 2 }
 0x20d   : > { %v1447_v30 = vpop.permute.xlu0 %1446  ;;  %v1532_v4 = vpop.permute.xlu2 %1531  ;;  %v1433_v20 = vadd.f32 %v1430_v63, %v1420_v18 }
 0x20e   : > { %1871 = vrot.lane.b32.xlu1 %v1086_v6, %s2584_s11 }
 0x20f   : > { %v1450_v38 = vadd.f32 %v3562_v19, %v1433_v20  ;;  %v1477_v19 = vmul.f32 %v1476_v57, %v2819_v16  ;;  %v1602_v20 = vstv %s2329_s27 }
 0x210   : > { %v1417_v46 = vpop.permute.xlu1 %1416  ;;  %v1604_v57 = vmul.f32 %v1602_v20, %v2876_v13 }
 0x211   : > { %v1421_v1 = vadd.f32 %v1417_v46, %v1404_v51 }
 0x213   : > { %v1434_v10 = vadd.f32 %v1429_v44, %v1421_v1  ;;  %v1560_v44 = vrot.slane %v1556_v5, 2 }
 0x215   : > { %v1451_v55 = vadd.f32 %v1447_v30, %v1434_v10  ;;  %v1486_v56 = vpop.permute.xlu0 %1485  ;;  %v1577_v42 = vpop.permute.xlu2 %1576  ;;  %v1562_v46 = vsel %vm387_vm1, %v1560_v44, %v1561_v22 }
 0x216   : > { %v1491_v3 = vadd.f32 %v1486_v56, %v1477_v19 }
 0x217   : > { %v1468_v34 = vadd.f32 %v1464_v36, %v1451_v55  ;;  %v1508_v36 = vstv %s2323_s6 }
 0x218   : > { %v1462_v31 = vpop.permute.xlu1 %1461  ;;  %v1510_v29 = vmul.f32 %v1508_v36, %v2823_v21  ;;  %v1509_v24 = vmul.f32 %v1508_v36, %v2819_v16  ;;  %v1505_v43 = vadd.f32 %v1500_v26, %v1491_v3  ;;  %v1603_v16 = vmul.f32 %v1602_v20, %v2864_v7 }
 0x219   : > { %v1467_v49 = vadd.f32 %v1462_v31, %v1450_v38  ;;  %v3603_v41 = vadd.f32 %v1470_v59, %v1468_v34 }
 0x21a   : > { %v1514_v61 = vrot.slane %v1510_v29, 1  ;;  %v1513_v39 = vrot.slane %v1509_v24, 1 }
 0x21b   : > { %v3605_v54 = vadd.f32 %v1470_v59, %v1467_v49  ;;  %v1474_v12 = vmax.f32 %v3603_v41, 0.0 }
 0x21c   : > { %v1515_v52 = vsel %vm339_vm0, %v1513_v39, %v1514_v61 }
 0x21d   : > { %v1473_v50 = vmax.f32 %v3605_v54, 0.0  ;;  %1875 = vrot.lane.b32.xlu0 %v1474_v12, %s2584_s11  ;;  %v1502_v35 = vpop.permute.xlu0 %1501  ;;  %v1596_v45 = vpop.permute.xlu2 %1595  ;;  %v1518_v15 = vadd.f32 %v1515_v52, %v1505_v43 }
 0x21f   : > { %1873 = vrot.lane.b32.xlu2 %v1473_v50, %s2584_s11 }
 0x220   : > { %v1488_v33 = vpop.permute.xlu1 %1487 }
 0x221   : > { %v1492_v2 = vadd.f32 %v1488_v33, %v1478_v27 }
 0x223   : > { %v1506_v25 = vadd.f32 %v1502_v35, %v1492_v2 }
 0x225   : > { %v1547_v8 = vpop.permute.xlu0 %1546  ;;  %v1519_v58 = vadd.f32 %v1514_v61, %v1506_v25  ;;  %v1628_v11 = vpop.permute.xlu2 %1627  ;;  %v3804_v61 = vrot.slane %v3198_v37, 1 }
 0x227   : > { %v1536_v26 = vadd.f32 %v1532_v4, %v1519_v58 }
 0x228   : > { %v1530_v9 = vpop.permute.xlu1 %1529 }
 0x229   : > { %v1535_v0 = vadd.f32 %v1530_v9, %v1518_v15 }
 0x22b   : > { %v1552_v30 = vadd.f32 %v1547_v8, %v1535_v0  ;;  %v1730_v0 = vstv %s2338_s7 }
 0x22d   : > { %v1579_v28 = vpop.permute.xlu0 %1578  ;;  %v1565_v1 = vadd.f32 %v1562_v46, %v1552_v30  ;;  %v1660_v38 = vpop.permute.xlu2 %1659  ;;  %v1764_v30 = vstv %s2341_s8 }
 0x22f   : > { %v1582_v21 = vadd.f32 %v1577_v42, %v1565_v1 }
 0x230   : > { %v1549_v18 = vpop.permute.xlu1 %1548 }
 0x231   : > { %v1553_v51 = vadd.f32 %v1549_v18, %v1536_v26  ;;  %v1732_v26 = vmul.f32 %v1730_v0, %v3130_v17  ;;  %v1766_v18 = vmul.f32 %v1764_v30, %v3130_v17 }
 0x233   : > { %v1566_v63 = vadd.f32 %v1561_v22, %v1553_v51  ;;  %v1770_v20 = vrot.slane %v1766_v18, 1 }
 0x235   : > { %v1614_v10 = vpop.permute.xlu0 %1613  ;;  %v1583_v56 = vadd.f32 %v1579_v28, %v1566_v63  ;;  %v1705_v3 = vpop.permute.xlu2 %1704  ;;  %v1731_v28 = vmul.f32 %v1730_v0, %v3104_v32 }
 0x237   : > { %v1600_v49 = vadd.f32 %v1596_v45, %v1583_v56  ;;  %v1811_v56 = vstv %s2344_s10 }
 0x238   : > { %v1594_v55 = vpop.permute.xlu1 %1593 }
 0x239   : > { %v1599_v59 = vadd.f32 %v1594_v55, %v1582_v21  ;;  %v1606_v36 = vadd.f32 %v1604_v57, %v1600_v49 }
 0x23b   : > { %v1605_v34 = vadd.f32 %v1603_v16, %v1599_v59 }
 0x23d   : > { %v1619_v31 = vadd.f32 %v1614_v10, %v1605_v34  ;;  %v1630_v4 = vpop.permute.xlu0 %1629  ;;  %v1724_v39 = vpop.permute.xlu2 %1723 }
 0x23f   : > { %v1633_v35 = vadd.f32 %v1628_v11, %v1619_v31  ;;  %v1812_v31 = vmul.f32 %v1811_v56, %v3104_v32 }
 0x240   : > { %v1616_v19 = vpop.permute.xlu1 %1615 }
 0x241   : > { %v1646_v33 = vadd.f32 %v3212_v14, %v1633_v35  ;;  %v1620_v29 = vadd.f32 %v1616_v19, %v1606_v36  ;;  %v3805_v14 = vrot.slane %v3206_v53, 2  ;;  %v1765_v53 = vmul.f32 %v1764_v30, %v3104_v32 }
 0x242   : > { %v1816_v19 = vrot.slane %v1812_v31, 2  ;;  %v1858_v32 = vstv %s2347_s12 }
 0x243   : > { %v1634_v27 = vadd.f32 %v1630_v4, %v1620_v29  ;;  %v1769_v10 = vrot.slane %v1765_v53, 1  ;;  %v1813_v4 = vmul.f32 %v1811_v56, %v3130_v17 }
 0x245   : > { %v1675_v42 = vpop.permute.xlu0 %1674  ;;  %v1647_v43 = vadd.f32 %v3804_v61, %v1634_v27  ;;  %v1756_v23 = vpop.permute.xlu2 %1755  ;;  %v1771_v16 = vsel %vm339_vm0, %v1769_v10, %v1770_v20  ;;  %v1817_v36 = vrot.slane %v1813_v4, 2 }
 0x247   : > { %v1664_v13 = vadd.f32 %v1660_v38, %v1647_v43  ;;  %v1818_v27 = vsel %vm387_vm1, %v1816_v19, %v1817_v36 }
 0x248   : > { %v1658_v24 = vpop.permute.xlu1 %1657 }
 0x249   : > { %v1663_v2 = vadd.f32 %v1658_v24, %v1646_v33 }
 0x24b   : > { %v1680_v7 = vadd.f32 %v1675_v42, %v1663_v2 }
 0x24d   : > { %v1707_v8 = vpop.permute.xlu0 %1706  ;;  %v1693_v45 = vadd.f32 %v3222_v60, %v1680_v7  ;;  %v1788_v1 = vpop.permute.xlu2 %1787 }
 0x24f   : > { %v1710_v62 = vadd.f32 %v1705_v3, %v1693_v45 }
 0x250   : > { %v1677_v25 = vpop.permute.xlu1 %1676 }
 0x251   : > { %v1681_v52 = vadd.f32 %v1677_v25, %v1664_v13 }
 0x253   : > { %v1694_v9 = vadd.f32 %v3805_v14, %v1681_v52 }
 0x255   : > { %v1742_v15 = vpop.permute.xlu0 %1741  ;;  %v1711_v5 = vadd.f32 %v1707_v8, %v1694_v9  ;;  %v1833_v35 = vpop.permute.xlu2 %1832 }
 0x257   : > { %v1728_v60 = vadd.f32 %v1724_v39, %v1711_v5 }
 0x258   : > { %v1722_v58 = vpop.permute.xlu1 %1721 }
 0x259   : > { %v1727_v37 = vadd.f32 %v1722_v58, %v1710_v62  ;;  %v1734_v46 = vadd.f32 %v1732_v26, %v1728_v60 }
 0x25b   : > { %v1733_v22 = vadd.f32 %v1731_v28, %v1727_v37 }
 0x25d   : > { %v1758_v11 = vpop.permute.xlu0 %1757  ;;  %v1747_v51 = vadd.f32 %v1742_v15, %v1733_v22  ;;  %v1852_v43 = vpop.permute.xlu2 %1851 }
 0x25f   : > { %v1761_v21 = vadd.f32 %v1756_v23, %v1747_v51 }
 0x260   : > { %v1744_v44 = vpop.permute.xlu1 %1743 }
 0x261   : > { %v1748_v63 = vadd.f32 %v1744_v44, %v1734_v46  ;;  %v1774_v38 = vadd.f32 %v1771_v16, %v1761_v21 }
 0x263   : > { %v1762_v55 = vadd.f32 %v1758_v11, %v1748_v63 }
 0x265   : > { %v1803_v34 = vpop.permute.xlu0 %1802  ;;  %v1775_v57 = vadd.f32 %v1770_v20, %v1762_v55 }
 0x267   : > { %v1792_v29 = vadd.f32 %v1788_v1, %v1775_v57 }
 0x268   : > { %v1786_v59 = vpop.permute.xlu1 %1785 }
 0x269   : > { %v1791_v49 = vadd.f32 %v1786_v59, %v1774_v38 }
 0x26b   : > { %v1808_v33 = vadd.f32 %v1803_v34, %v1791_v49 }
 0x26d   : > { %v1821_v2 = vadd.f32 %v1818_v27, %v1808_v33  ;;  %v1835_v7 = vpop.permute.xlu0 %1834 }
 0x26f   : > { %v1838_v8 = vadd.f32 %v1833_v35, %v1821_v2 }
 0x270   : > { %v1805_v3 = vpop.permute.xlu1 %1804 }
 0x271   : > { %v1809_v42 = vadd.f32 %v1805_v3, %v1792_v29 }
 0x273   : > { %v1822_v24 = vadd.f32 %v1817_v36, %v1809_v42 }
 0x275   : > { %v1839_v61 = vadd.f32 %v1835_v7, %v1822_v24  ;;  %v1870_v0 = vpop.permute.xlu0 %1869 }
 0x276   : > { %v1887_v47 = vmax.f32 %v1085_v40, %v1870_v0 }
 0x277   : > { %v1856_v17 = vadd.f32 %v1852_v43, %v1839_v61 }
 0x278   : > { %v1850_v45 = vpop.permute.xlu1 %1849 }
 0x279   : > { %v1855_v39 = vadd.f32 %v1850_v45, %v1838_v8  ;;  %v1860_v13 = vadd.f32 %v1858_v32, %v1856_v17  ;;  %v1874_v41 = vpop.permute.xlu2 %1873 }
 0x27a   : > { %v1889_v26 = vmax.f32 %v1473_v50, %v1874_v41 }
 0x27b   : > { %v1859_v25 = vadd.f32 %v1858_v32, %v1855_v39  ;;  %v1862_v52 = vmax.f32 %v1860_v13, 0.0 }
 0x27c   : > { %v1902_v11 = vrot.slane %v1889_v26, 1 }
 0x27d   : > { %v1861_v14 = vmax.f32 %v1859_v25, 0.0  ;;  %1879 = vrot.lane.b32.xlu2 %v1862_v52, %s2584_s11 }
 0x27f   : > { %1877 = vrot.lane.b32.xlu1 %v1861_v14, %s2584_s11 }
 0x280   : > { %v1872_v9 = vpop.permute.xlu1 %1871 }
 0x281   : > { %v1888_v15 = vmax.f32 %v1086_v6, %v1872_v9  ;;  %v1899_v6 = vrot.slane %v1887_v47, 1 }
 0x283   : > { %v1900_v62 = vrot.slane %v1888_v15, 1 }
 0x285   : > { %v3643_v23 = vmax.f32 %v1888_v15, %v1900_v62  ;;  %v1901_v22 = vsel %vm339_vm0, %v1899_v6, %v1900_v62 }
 0x286   : > { %v3658_v60 = vmax.f32 %v1887_v47, %v1901_v22 }
 0x287   : > { %1928 = vrot.lane.b32.xlu1 %v3643_v23, %s2584_s11 }
 0x28f   : > { %1946 = vrot.lane.b32.xlu1 %v3643_v23, %s2583_s9  ;;  %v1876_v58 = vpop.permute.xlu0 %1875 }
 0x290   : > { %v1890_v5 = vmax.f32 %v1474_v12, %v1876_v58 }
 0x292   : > { %v1903_v37 = vrot.slane %v1890_v5, 1 }
 0x294   : > { %v1917_v28 = vmax.f32 %v1890_v5, %v1903_v37  ;;  %v1904_v44 = vsel %vm339_vm0, %v1902_v11, %v1903_v37 }
 0x295   : > { %v1916_v53 = vmax.f32 %v1889_v26, %v1904_v44 }
 0x296   : > { %1932 = vrot.lane.b32.xlu0 %v1917_v28, %s2584_s11 }
 0x297   : > { %1964 = vrot.lane.b32.xlu1 %v3643_v23, %s2585_s13 }
 0x29e   : > { %1950 = vrot.lane.b32.xlu0 %v1917_v28, %s2583_s9 }
 0x2a6   : > { %1926 = vrot.lane.b32.xlu0 %v3658_v60, %s2584_s11 }
 0x2ae   : > { %1944 = vrot.lane.b32.xlu0 %v3658_v60, %s2583_s9 }
 0x2b6   : > { %1962 = vrot.lane.b32.xlu0 %v3658_v60, %s2585_s13 }
 0x2d7   : > { %v1880_v12 = vpop.permute.xlu2 %1879 }
 0x2d8   : > { %v1892_v48 = vmax.f32 %v1862_v52, %v1880_v12 }
 0x2da   : > { %v1906_v40 = vrot.slane %v1892_v48, 1 }
 0x2dc   : > { %v3666_v30 = vmax.f32 %v1892_v48, %v1906_v40 }
 0x2de   : > { %1936 = vrot.lane.b32.xlu2 %v3666_v30, %s2584_s11 }
 0x2e6   : > { %1954 = vrot.lane.b32.xlu2 %v3666_v30, %s2583_s9 }
 0x2ee   : > { %1930 = vrot.lane.b32.xlu2 %v1916_v53, %s2584_s11 }
 0x2f1   : > { %v1878_v18 = vpop.permute.xlu1 %1877 }
 0x2f2   : > { %v1891_v51 = vmax.f32 %v1861_v14, %v1878_v18 }
 0x2f4   : > { %v1905_v46 = vrot.slane %v1891_v51, 1 }
 0x2f6   : > { %v1907_v1 = vsel %vm339_vm0, %v1905_v46, %v1906_v40  ;;  %1948 = vrot.lane.b32.xlu2 %v1916_v53, %s2583_s9 }
 0x2f7   : > { %v1918_v63 = vmax.f32 %v1891_v51, %v1907_v1 }
 0x2f9   : > { %1934 = vrot.lane.b32.xlu1 %v1918_v63, %s2584_s11  ;;  %1970 = vrot.lane.b32.xlu0 %v1918_v63, %s2585_s13  ;;  %v3695_v16 = vpop.permute.xlu1 %1928 }
 0x2fe   : > { %1966 = vrot.lane.b32.xlu2 %v1916_v53, %s2585_s13 }
 0x301   : > { %1952 = vrot.lane.b32.xlu1 %v1918_v63, %s2583_s9  ;;  %1988 = vrot.lane.b32.xlu0 %v1918_v63, %s2586_s21  ;;  %v1947_v49 = vpop.permute.xlu1 %1946  ;;  %s2351_s9 = smul.u32 24, %s3811_s22 }
 0x303   : > { %s3731_s15 = scalar_lea.vmem %s3788_s5, %s2351_s9 }
 0x306   : > { %1984 = vrot.lane.b32.xlu2 %v1916_v53, %s2586_s21 }
 0x308   : > { %v1933_v54 = vpop.permute.xlu0 %1932 }
 0x309   : > { %1980 = vrot.lane.b32.xlu1 %v3658_v60, %s2586_s21  ;;  %2006 = vrot.lane.b32.xlu0 %v1918_v63, %s2587_s14  ;;  %v2020_v50 = vsel %vm2016_vm2, %v1917_v28, %v1933_v54  ;;  %v1965_v19 = vpop.permute.xlu1 %1964 }
 0x30e   : > { %2002 = vrot.lane.b32.xlu2 %v1916_v53, %s2587_s14 }
 0x310   : > { %v1951_v10 = vpop.permute.xlu0 %1950 }
 0x311   : > { %v3685_v20 = vsel %vm2023_vm3, %v2020_v50, %v1951_v10  ;;  %1998 = vrot.lane.b32.xlu1 %v3658_v60, %s2587_s14  ;;  %1982 = vrot.lane.b32.xlu0 %v3643_v23, %s2586_s21 }
 0x316   : > { %1972 = vrot.lane.b32.xlu2 %v3666_v30, %s2585_s13 }
 0x318   : > { %v1927_v59 = vpop.permute.xlu0 %1926 }
 0x319   : > { %1968 = vrot.lane.b32.xlu1 %v1917_v28, %s2585_s13  ;;  %2000 = vrot.lane.b32.xlu0 %v3643_v23, %s2587_s14  ;;  %v2017_v14 = vsel %vm2016_vm2, %v3658_v60, %v1927_v59 }
 0x31e   : > { %1990 = vrot.lane.b32.xlu2 %v3666_v30, %s2586_s21 }
 0x320   : > { %v1945_v57 = vpop.permute.xlu0 %1944 }
 0x321   : > { %1986 = vrot.lane.b32.xlu1 %v1917_v28, %s2586_s21  ;;  %v2024_v62 = vsel %vm2023_vm3, %v2017_v14, %v1945_v57 }
 0x326   : > { %2008 = vrot.lane.b32.xlu2 %v3666_v30, %s2587_s14 }
 0x328   : > { %v1963_v36 = vpop.permute.xlu0 %1962 }
 0x329   : > { %2004 = vrot.lane.b32.xlu1 %v1917_v28, %s2587_s14  ;;  %v2031_v37 = vsel %vm2030_vm4, %v2024_v62, %v1963_v36 }
 0x338   : > { %v1937_v21 = vpop.permute.xlu2 %1936 }
 0x339   : > { %v2022_v39 = vsel %vm2016_vm2, %v3666_v30, %v1937_v21 }
 0x340   : > { %v1955_v55 = vpop.permute.xlu2 %1954 }
 0x341   : > { %v2029_v52 = vsel %vm2023_vm3, %v2022_v39, %v1955_v55 }
 0x348   : > { %v1931_v56 = vpop.permute.xlu2 %1930 }
 0x349   : > { %v2019_v38 = vsel %vm2016_vm2, %v1916_v53, %v1931_v56  ;;  %v2018_v53 = vsel %vm2016_vm2, %v3643_v23, %v3695_v16 }
 0x34a   : > { %v2025_v51 = vsel %vm2023_vm3, %v2018_v53, %v1947_v49 }
 0x34b   : > { %v2032_v46 = vsel %vm2030_vm4, %v2025_v51, %v1965_v19 }
 0x350   : > { %v1949_v34 = vpop.permute.xlu2 %1948 }
 0x351   : > { %v3699_v31 = vsel %vm2023_vm3, %v2019_v38, %v1949_v34 }
 0x358   : > { %v3701_v4 = vpop.permute.xlu2 %1966 }
 0x359   : > { %v2033_v16 = vsel %vm2030_vm4, %v3699_v31, %v3701_v4 }
 0x360   : > { %v3703_v35 = vpop.permute.xlu2 %1984 }
 0x361   : > { %v2040_v38 = vsel %vm2037_vm5, %v2033_v16, %v3703_v35 }
 0x368   : > { %v3705_v33 = vpop.permute.xlu2 %2002 }
 0x369   : > { %v2047_v49 = vsel %vm2044_vm6, %v2040_v38, %v3705_v33 }
 0x36a   : > { %v2055_v19 = vrot.slane %v2047_v49, 1  ;;  %v2061_v36 = vrot.slane %v2047_v49, 2 }
 0x36b   : > { %v1935_v29 = vpop.permute.xlu1 %1934  ;;  %v1971_v3 = vpop.permute.xlu0 %1970 }
 0x36c   : > { %v2021_v2 = vsel %vm2016_vm2, %v1918_v63, %v1935_v29  ;;  %v2089_v29 = vsel %vm2087_vm7, %v2047_v49, %v2055_v19 }
 0x36d   : > { %v2093_v4 = vsel %vm2091_vm8, %v2089_v29, %v2061_v36 }
 0x370   : > { %v1973_v42 = vpop.permute.xlu2 %1972 }
 0x371   : > { %v2036_v9 = vsel %vm2030_vm4, %v2029_v52, %v1973_v42  ;;  %v2067_v42 = vrot.slane %v2047_v49, 3 }
 0x373   : > { %v1953_v27 = vpop.permute.xlu1 %1952  ;;  %v1989_v24 = vpop.permute.xlu0 %1988 }
 0x374   : > { %v2028_v7 = vsel %vm2023_vm3, %v2021_v2, %v1953_v27  ;;  %v2097_v2 = vsel %vm2095_vm10, %v2093_v4, %v2067_v42 }
 0x375   : > { %v2035_v61 = vsel %vm2030_vm4, %v2028_v7, %v1971_v3 }
 0x376   : > { %v2042_v32 = vsel %vm2037_vm5, %v2035_v61, %v1989_v24 }
 0x378   : > { %v1991_v43 = vpop.permute.xlu2 %1990 }
 0x379   : > { %v2043_v0 = vsel %vm2037_vm5, %v2036_v9, %v1991_v43 }
 0x37b   : > { %v1981_v8 = vpop.permute.xlu1 %1980  ;;  %v2007_v17 = vpop.permute.xlu0 %2006 }
 0x37c   : > { %v2049_v45 = vsel %vm2044_vm6, %v2042_v32, %v2007_v17  ;;  %v2038_v60 = vsel %vm2037_vm5, %v2031_v37, %v1981_v8 }
 0x37d   : > { %v2056_v13 = vrot.slane %v2049_v45, 1  ;;  %v2062_v25 = vrot.slane %v2049_v45, 2  ;;  %v2068_v28 = vrot.slane %v2049_v45, 3 }
 0x37f   : > { %v2090_v15 = vsel %vm2087_vm7, %v2049_v45, %v2056_v13 }
 0x380   : > { %v2094_v58 = vsel %vm2091_vm8, %v2090_v15, %v2062_v25  ;;  %v2009_v5 = vpop.permute.xlu2 %2008 }
 0x381   : > { %v2050_v47 = vsel %vm2044_vm6, %v2043_v0, %v2009_v5  ;;  %v2098_v41 = vsel %vm2095_vm10, %v2094_v58, %v2068_v28 }
 0x382   : > { %v2077_v6 = vrot.slane %v2050_v47, 4  ;;  %v2083_v22 = vrot.slane %v2050_v47, 5 }
 0x383   : > { %v1999_v12 = vpop.permute.xlu1 %1998  ;;  %v1983_v48 = vpop.permute.xlu0 %1982 }
 0x384   : > { %v2102_v40 = vsel %vm2099_vm9, %v2098_v41, %v2077_v6  ;;  %v2045_v30 = vsel %vm2044_vm6, %v2038_v60, %v1999_v12  ;;  %v2039_v63 = vsel %vm2037_vm5, %v2032_v46, %v1983_v48 }
 0x385   : > { %v2106_v26 = vsel %vm2103_vm11, %v2102_v40, %v2083_v22  ;;  %v2054_v11 = vrot.slane %v2045_v30, 1  ;;  %v2060_v44 = vrot.slane %v2045_v30, 2  ;;  %v2066_v10 = vrot.slane %v2045_v30, 3 }
 0x386   : > { %2110 = vst.msk [vmem:[%s3731_s15 + $0x10] sm:$0x3f] %vm2107_vm12, %v2106_v26 }
 0x387   : > { %v2088_v18 = vsel %vm2087_vm7, %v2045_v30, %v2054_v11 }
 0x388   : > { %v2092_v1 = vsel %vm2091_vm8, %v2088_v18, %v2060_v44 }
 0x389   : > { %v2096_v23 = vsel %vm2095_vm10, %v2092_v1, %v2066_v10 }
 0x38b   : > { %v1969_v54 = vpop.permute.xlu1 %1968  ;;  %v2001_v50 = vpop.permute.xlu0 %2000 }
 0x38c   : > { %v2046_v21 = vsel %vm2044_vm6, %v2039_v63, %v2001_v50  ;;  %v2034_v31 = vsel %vm2030_vm4, %v3685_v20, %v1969_v54 }
 0x38d   : > { %v2075_v55 = vrot.slane %v2046_v21, 4  ;;  %v2081_v56 = vrot.slane %v2046_v21, 5 }
 0x38f   : > { %v2100_v59 = vsel %vm2099_vm9, %v2096_v23, %v2075_v55 }
 0x390   : > { %v2104_v34 = vsel %vm2103_vm11, %v2100_v59, %v2081_v56 }
 0x391   : > { %2108 = vst.msk [vmem:[%s3731_s15] sm:$0x3f] %vm2107_vm12, %v2104_v34 }
 0x393   : > { %v1987_v57 = vpop.permute.xlu1 %1986 }
 0x394   : > { %v2041_v35 = vsel %vm2037_vm5, %v2034_v31, %v1987_v57 }
 0x39b   : > { %v2005_v3 = vpop.permute.xlu1 %2004 }
 0x39c   : > { %v2048_v27 = vsel %vm2044_vm6, %v2041_v35, %v2005_v3 }
 0x39d   : > { %v2076_v33 = vrot.slane %v2048_v27, 4  ;;  %v2082_v24 = vrot.slane %v2048_v27, 5 }
 0x39f   : > { %v2101_v7 = vsel %vm2099_vm9, %v2097_v2, %v2076_v33 }
 0x3a0   : > { %v2105_v61 = vsel %vm2103_vm11, %v2101_v7, %v2082_v24 }
 0x3a1   : > { %2109 = vst.msk [vmem:[%s3731_s15 + $0x8] sm:$0x3f] %vm2107_vm12, %v2105_v61 }
 0x3a2 PF: > { %p18_p4 = scmp.ge.s32.totalorder %s2670_s16, 4   ;;  %s3806_s18 = smov %s2567_s19 }
 0x3a3   : > { %s3807_s19 = smov %s2571_s20  ;;  %s3808_s20 = smov %s2679_s24 }
 0x3a4   : > { %s3809_s21 = smov %s2670_s16  ;;  %20 = sbr.rel (!%p18_p4) target bundleno = 6 (0x6), region = 98 }
 0x3a9   :  { %2132 = vsyncpa [#allocation3], 1 }
 0x3aa   :  { %2134 = vsyncpa [#allocation3 + $0x1], 1 }
 0x3ab   :  { %2135 = vsyncpa [#allocation4], 1 }
 0x3ac   :  { %2137 = vsyncpa [#allocation4 + $0x1], 1 }
 0x3ad   :  { %2138 = vsyncpa [#allocation5], 1 }
 0x3ae   :  { %2140 = vsyncpa [#allocation5 + $0x1], 1 }
 0x3af   :  { %2141 = vsyncpa [#allocation9], 1 }

</bundles_post_ra>
